<compile_context>
chip_gen: v5e
topology: v5e:2x2
jax: 0.10.0
libtpu: 0.0.40
codegen_flags: <defaults>
</compile_context>

<pallas_src>
import jax
import jax.numpy as jnp
import numpy as np
from jax.experimental import pallas as pl
from jax.experimental.pallas import tpu as pltpu

LEAKY_SLOPE = 0.01   # F.leaky_relu default negative_slope
LANE = 128           # TPU lane width
DEF_TILE_B = 128     # batch rows per grid step


def _leaky_relu(x):
    return jnp.where(x > 0, x, LEAKY_SLOPE * x)


def _round_up(x, m):
    return ((x + m - 1) // m) * m


# --------------------------------------------------------------------------- #
# Kernel
# --------------------------------------------------------------------------- #
def critic_kernel(sa_ref,
                  w1_ref, b1_ref,
                  w2s_ref, w2a_ref, b2_ref,
                  w3_ref, b3_ref,
                  w4_ref, b4_ref,
                  out_ref):
    sa = sa_ref[...]                                             # (tb, 128) bf16

    # layer 1: xs = leaky_relu(state @ W1 + b1)   (action lanes of W1_pad are 0)
    h1 = jnp.dot(sa, w1_ref[...], preferred_element_type=jnp.float32)
    xs = _leaky_relu(h1 + b1_ref[...]).astype(jnp.bfloat16)

    # layer 2: leaky_relu(cat([xs, a]) @ W2 + b2)
    #        == leaky_relu(xs @ W2s + sa @ W2a_pad + b2)
    h2a = jnp.dot(sa, w2a_ref[...], preferred_element_type=jnp.float32)
    h2 = jnp.dot(xs, w2s_ref[...], preferred_element_type=jnp.float32) + h2a
    x = _leaky_relu(h2 + b2_ref[...]).astype(jnp.bfloat16)

    # layer 3: leaky_relu(x @ W3 + b3)
    x3 = jnp.dot(x, w3_ref[...], preferred_element_type=jnp.float32)
    x3 = _leaky_relu(x3 + b3_ref[...])

    # layer 4 (H2 -> 1): VPU broadcast-mul + lane reduction (w4_ref is (1, H2)).
    out_ref[...] = jnp.sum(x3 * w4_ref[...], axis=-1, keepdims=True) + b4_ref[...]


# --------------------------------------------------------------------------- #
# Wrapper
# --------------------------------------------------------------------------- #
def critic_forward(state, action, kparams, *, tile_b=DEF_TILE_B):
    """Full Critic forward in one pallas_call (batch-tiled 1-D grid)."""
    (w1p, b1, w2s, w2ap, b2, w3, b3, w4r, b4) = kparams
    B = state.shape[0]
    sa_pad = w1p.shape[0]
    h0 = w1p.shape[1]
    h1 = w2s.shape[1]
    h2 = w3.shape[1]

    # Concatenate state|action once, pad batch rows + feature lanes, cast bf16.
    b_pad = _round_up(max(B, 1), tile_b)
    sa = jnp.concatenate([state, action], axis=1).astype(jnp.bfloat16)
    sa = jnp.pad(sa, ((0, b_pad - B), (0, sa_pad - sa.shape[1])))

    inputs = (sa, w1p, b1, w2s, w2ap, b2, w3, b3, w4r, b4)

    row = lambda i: (i, 0)     # batch-tiled operands
    const = lambda i: (0, 0)   # resident weights / biases (same block every step)
    in_specs = [
        pl.BlockSpec((tile_b, sa_pad), row),   # [state|action] padded slab
        pl.BlockSpec((sa_pad, h0), const),     # W1 (state rows, action rows = 0)
        pl.BlockSpec((1, h0), const),          # b1
        pl.BlockSpec((h0, h1), const),         # W2 (xs part)
        pl.BlockSpec((sa_pad, h1), const),     # W2 (action part, padded rows)
        pl.BlockSpec((1, h1), const),          # b2
        pl.BlockSpec((h1, h2), const),         # W3
        pl.BlockSpec((1, h2), const),          # b3
        pl.BlockSpec((1, h2), const),          # W4 row (f32)
        pl.BlockSpec((1, 1), const),           # b4
    ]
    out_specs = pl.BlockSpec((tile_b, 1), row)

    flops = 2 * b_pad * (sa_pad * h0 + sa_pad * h1 + h0 * h1 + h1 * h2 + h2)
    bytes_accessed = (sum(int(np.prod(x.shape)) * x.dtype.itemsize for x in inputs)
                      + b_pad * 4)
    cost = pl.CostEstimate(flops=flops, transcendentals=0,
                           bytes_accessed=bytes_accessed)

    out = pl.pallas_call(
        critic_kernel,
        out_shape=jax.ShapeDtypeStruct((b_pad, 1), jnp.float32),
        grid=(b_pad // tile_b,),
        in_specs=in_specs,
        out_specs=out_specs,
        compiler_params=pltpu.CompilerParams(
            dimension_semantics=("parallel",)),
        cost_estimate=cost,
    )(*inputs)
    return out[:B]


# --------------------------------------------------------------------------- #
# Parameter construction (mirrors the PyTorch module's reset_params quirks)
# --------------------------------------------------------------------------- #
def init_critic_params(key, state_dim, action_dim, hidden=(256, 256, 128)):
    """f32 params, stored (in_features, out_features); biases (1, out).

    hidden_init in the original code uses fan_in = weight.size(0) == out_features;
    we reproduce that.  Biases keep the default nn.Linear range 1/sqrt(in_features).
    """
    h0, h1, h2 = hidden
    keys = jax.random.split(key, 8)

    def u(k, shape, lim):
        return jax.random.uniform(k, shape, jnp.float32, -lim, lim)

    w1 = u(keys[0], (state_dim, h0), 1.0 / np.sqrt(h0))
    b1 = u(keys[1], (1, h0), 1.0 / np.sqrt(state_dim))
    w2 = u(keys[2], (h0 + action_dim, h1), 1.0 / np.sqrt(h1))
    b2 = u(keys[3], (1, h1), 1.0 / np.sqrt(h0 + action_dim))
    w3 = u(keys[4], (h1, h2), 1.0 / np.sqrt(h2))
    b3 = u(keys[5], (1, h2), 1.0 / np.sqrt(h1))
    w4 = u(keys[6], (h2, 1), 0.003)
    b4 = u(keys[7], (1, 1), 1.0 / np.sqrt(h2))
    return (w1, b1, w2, b2, w3, b3, w4, b4)


def prepare_kernel_params(params, state_dim, action_dim):
    """Split W2, build 128-lane padded [state|action] weight slabs, cast bf16."""
    (w1, b1, w2, b2, w3, b3, w4, b4) = params
    h0 = w1.shape[1]
    h1 = w2.shape[1]
    assert h0 % LANE == 0 and h1 % LANE == 0 and w3.shape[1] % LANE == 0, \
        "hidden dims must be multiples of 128 for this kernel"
    sa_pad = _round_up(state_dim + action_dim, LANE)

    # Layer-1 weights: state rows of W1, zeros at action/pad lanes.
    w1p = jnp.zeros((sa_pad, h0), jnp.bfloat16).at[:state_dim].set(
        w1.astype(jnp.bfloat16))
    # Layer-2 split: xs part, and action part placed at the action lanes of sa.
    w2s = w2[:h0].astype(jnp.bfloat16)
    w2ap = jnp.zeros((sa_pad, h1), jnp.bfloat16)
    w2ap = w2ap.at[state_dim:state_dim + action_dim].set(
        w2[h0:h0 + action_dim].astype(jnp.bfloat16))
    w3p = w3.astype(jnp.bfloat16)
    w4_row = w4.reshape(1, -1).astype(jnp.float32)   # (1, h2) for VPU layer 4
    return (w1p, b1, w2s, w2ap, b2, w3p, b3, w4_row, b4)


# --------------------------------------------------------------------------- #
# References
# --------------------------------------------------------------------------- #
def critic_reference_f32(state, action, params):
    """Original-module semantics, pure f32 JAX."""
    (w1, b1, w2, b2, w3, b3, w4, b4) = params
    xs = _leaky_relu(state @ w1 + b1)
    x = jnp.concatenate([xs, action], axis=1)
    x = _leaky_relu(x @ w2 + b2)
    x = _leaky_relu(x @ w3 + b3)
    return x @ w4 + b4


def critic_reference_bf16(state, action, kparams):
    """Pure-JAX reference mirroring the kernel's bf16/f32 precision recipe."""
    (w1p, b1, w2s, w2ap, b2, w3, b3, w4r, b4) = kparams
    sa = jnp.concatenate([state, action], axis=1).astype(jnp.bfloat16)
    sa = jnp.pad(sa, ((0, 0), (0, w1p.shape[0] - sa.shape[1])))
    xs = _leaky_relu(jnp.dot(sa, w1p, preferred_element_type=jnp.float32) + b1)
    h = jnp.dot(xs.astype(jnp.bfloat16), w2s, preferred_element_type=jnp.float32)
    h = h + jnp.dot(sa, w2ap, preferred_element_type=jnp.float32)
    x = _leaky_relu(h + b2)
    x = _leaky_relu(jnp.dot(x.astype(jnp.bfloat16), w3,
                            preferred_element_type=jnp.float32) + b3)
    return jnp.sum(x * w4r, axis=-1, keepdims=True) + b4


# --------------------------------------------------------------------------- #
if __name__ == "__main__":
    B = 256            # two 128-row tiles -> exercises the batch grid
    STATE_DIM = 33     # Reacher-unity observation size
    ACTION_DIM = 4     # Reacher-unity action size
    HIDDEN = (256, 256, 128)

    key = jax.random.PRNGKey(0)
    k_params, k_state, k_action = jax.random.split(key, 3)

    params_f32 = init_critic_params(k_params, STATE_DIM, ACTION_DIM, HIDDEN)
    kparams = prepare_kernel_params(params_f32, STATE_DIM, ACTION_DIM)

    state = jax.random.normal(k_state, (B, STATE_DIM), dtype=jnp.float32)
    action = jax.random.uniform(k_action, (B, ACTION_DIM), dtype=jnp.float32,
                                minval=-1.0, maxval=1.0)

    q = critic_forward(state, action, kparams)
    q = jax.block_until_ready(q)
    assert q.shape == (B, 1) and q.dtype == jnp.float32

    # Tight check: kernel vs pure-JAX reference using the identical bf16 recipe.
    q_bf = critic_reference_bf16(state, action, kparams)
    np.testing.assert_allclose(np.asarray(q), np.asarray(q_bf),
                               rtol=1e-3, atol=1e-4)

    # Semantic check: vs the original f32 module forward (bf16 quantization noise).
    q_f32 = critic_reference_f32(state, action, params_f32)
    np.testing.assert_allclose(np.asarray(q), np.asarray(q_f32),
                               rtol=5e-2, atol=5e-3)

    print("KERNEL_OK")
</pallas_src>

<mosaic_0001>
module attributes {stable_mosaic.version = 11 : i64} {
  func.func @critic_kernel(%arg0: i32, %arg1: memref<128x128xbf16, #tpu.memory_space<vmem>>, %arg2: memref<128x256xbf16, #tpu.memory_space<vmem>>, %arg3: memref<1x256xf32, #tpu.memory_space<vmem>>, %arg4: memref<256x256xbf16, #tpu.memory_space<vmem>>, %arg5: memref<128x256xbf16, #tpu.memory_space<vmem>>, %arg6: memref<1x256xf32, #tpu.memory_space<vmem>>, %arg7: memref<256x128xbf16, #tpu.memory_space<vmem>>, %arg8: memref<1x128xf32, #tpu.memory_space<vmem>>, %arg9: memref<1x128xf32, #tpu.memory_space<vmem>>, %arg10: memref<1x1xf32, #tpu.memory_space<vmem>>, %arg11: memref<128x1xf32, #tpu.memory_space<vmem>>) attributes {dimension_semantics = [#tpu.dimension_semantics<parallel>], iteration_bounds = array<i64: 2>, scalar_prefetch = 0 : i64, scratch_operands = 0 : i64, tpu.core_type = #tpu.core_type<tc>, window_params = [{transform_indices = @transform_0, window_bounds = array<i64: 128, 128>}, {pipeline_mode = #tpu.pipeline_mode<synchronous>, transform_indices = @transform_1, window_bounds = array<i64: 128, 256>}, {pipeline_mode = #tpu.pipeline_mode<synchronous>, transform_indices = @transform_2, window_bounds = array<i64: 1, 256>}, {pipeline_mode = #tpu.pipeline_mode<synchronous>, transform_indices = @transform_3, window_bounds = array<i64: 256, 256>}, {pipeline_mode = #tpu.pipeline_mode<synchronous>, transform_indices = @transform_4, window_bounds = array<i64: 128, 256>}, {pipeline_mode = #tpu.pipeline_mode<synchronous>, transform_indices = @transform_5, window_bounds = array<i64: 1, 256>}, {pipeline_mode = #tpu.pipeline_mode<synchronous>, transform_indices = @transform_6, window_bounds = array<i64: 256, 128>}, {pipeline_mode = #tpu.pipeline_mode<synchronous>, transform_indices = @transform_7, window_bounds = array<i64: 1, 128>}, {pipeline_mode = #tpu.pipeline_mode<synchronous>, transform_indices = @transform_8, window_bounds = array<i64: 1, 128>}, {pipeline_mode = #tpu.pipeline_mode<synchronous>, transform_indices = @transform_9, window_bounds = array<i64: 1, 1>}, {transform_indices = @transform_10, window_bounds = array<i64: 128, 1>}]} {
    %c0 = arith.constant 0 : index
    %c0_0 = arith.constant 0 : index
    %0 = vector.load %arg1[%c0, %c0_0] : memref<128x128xbf16, #tpu.memory_space<vmem>>, vector<128x128xbf16>
    %c0_1 = arith.constant 0 : index
    %c0_2 = arith.constant 0 : index
    %1 = vector.load %arg2[%c0_1, %c0_2] : memref<128x256xbf16, #tpu.memory_space<vmem>>, vector<128x256xbf16>
    %cst = arith.constant dense<0.000000e+00> : vector<128x256xf32>
    %2 = tpu.matmul %0, %1, %cst {dimension_numbers = #tpu.dot_dimension_numbers<[1], [0], [0], [1], [0, 0, 1, 1], [], []>} : vector<128x128xbf16>, vector<128x256xbf16>, vector<128x256xf32> -> vector<128x256xf32>
    %c0_3 = arith.constant 0 : index
    %c0_4 = arith.constant 0 : index
    %3 = vector.load %arg3[%c0_3, %c0_4] : memref<1x256xf32, #tpu.memory_space<vmem>>, vector<1x256xf32>
    %4 = vector.broadcast %3 : vector<1x256xf32> to vector<128x256xf32>
    %5 = arith.addf %2, %4 : vector<128x256xf32>
    %cst_5 = arith.constant 0.000000e+00 : f32
    %6 = vector.broadcast %cst_5 : f32 to vector<128x256xf32>
    %7 = arith.cmpf ogt, %5, %6 : vector<128x256xf32>
    %cst_6 = arith.constant 0.00999999977 : f32
    %8 = vector.broadcast %cst_6 : f32 to vector<128x256xf32>
    %9 = arith.mulf %8, %5 : vector<128x256xf32>
    %10 = arith.select %7, %5, %9 : vector<128x256xi1>, vector<128x256xf32>
    %11 = arith.truncf %10 : vector<128x256xf32> to vector<128x256xbf16>
    %c0_7 = arith.constant 0 : index
    %c0_8 = arith.constant 0 : index
    %12 = vector.load %arg5[%c0_7, %c0_8] : memref<128x256xbf16, #tpu.memory_space<vmem>>, vector<128x256xbf16>
    %cst_9 = arith.constant dense<0.000000e+00> : vector<128x256xf32>
    %13 = tpu.matmul %0, %12, %cst_9 {dimension_numbers = #tpu.dot_dimension_numbers<[1], [0], [0], [1], [0, 0, 1, 1], [], []>} : vector<128x128xbf16>, vector<128x256xbf16>, vector<128x256xf32> -> vector<128x256xf32>
    %c0_10 = arith.constant 0 : index
    %c0_11 = arith.constant 0 : index
    %14 = vector.load %arg4[%c0_10, %c0_11] : memref<256x256xbf16, #tpu.memory_space<vmem>>, vector<256x256xbf16>
    %cst_12 = arith.constant dense<0.000000e+00> : vector<128x256xf32>
    %15 = tpu.matmul %11, %14, %cst_12 {dimension_numbers = #tpu.dot_dimension_numbers<[1], [0], [0], [1], [0, 0, 1, 1], [], []>} : vector<128x256xbf16>, vector<256x256xbf16>, vector<128x256xf32> -> vector<128x256xf32>
    %16 = arith.addf %15, %13 : vector<128x256xf32>
    %c0_13 = arith.constant 0 : index
    %c0_14 = arith.constant 0 : index
    %17 = vector.load %arg6[%c0_13, %c0_14] : memref<1x256xf32, #tpu.memory_space<vmem>>, vector<1x256xf32>
    %18 = vector.broadcast %17 : vector<1x256xf32> to vector<128x256xf32>
    %19 = arith.addf %16, %18 : vector<128x256xf32>
    %cst_15 = arith.constant 0.000000e+00 : f32
    %20 = vector.broadcast %cst_15 : f32 to vector<128x256xf32>
    %21 = arith.cmpf ogt, %19, %20 : vector<128x256xf32>
    %cst_16 = arith.constant 0.00999999977 : f32
    %22 = vector.broadcast %cst_16 : f32 to vector<128x256xf32>
    %23 = arith.mulf %22, %19 : vector<128x256xf32>
    %24 = arith.select %21, %19, %23 : vector<128x256xi1>, vector<128x256xf32>
    %25 = arith.truncf %24 : vector<128x256xf32> to vector<128x256xbf16>
    %c0_17 = arith.constant 0 : index
    %c0_18 = arith.constant 0 : index
    %26 = vector.load %arg7[%c0_17, %c0_18] : memref<256x128xbf16, #tpu.memory_space<vmem>>, vector<256x128xbf16>
    %cst_19 = arith.constant dense<0.000000e+00> : vector<128x128xf32>
    %27 = tpu.matmul %25, %26, %cst_19 {dimension_numbers = #tpu.dot_dimension_numbers<[1], [0], [0], [1], [0, 0, 1, 1], [], []>} : vector<128x256xbf16>, vector<256x128xbf16>, vector<128x128xf32> -> vector<128x128xf32>
    %c0_20 = arith.constant 0 : index
    %c0_21 = arith.constant 0 : index
    %28 = vector.load %arg8[%c0_20, %c0_21] : memref<1x128xf32, #tpu.memory_space<vmem>>, vector<1x128xf32>
    %29 = vector.broadcast %28 : vector<1x128xf32> to vector<128x128xf32>
    %30 = arith.addf %27, %29 : vector<128x128xf32>
    %cst_22 = arith.constant 0.000000e+00 : f32
    %31 = vector.broadcast %cst_22 : f32 to vector<128x128xf32>
    %32 = arith.cmpf ogt, %30, %31 : vector<128x128xf32>
    %cst_23 = arith.constant 0.00999999977 : f32
    %33 = vector.broadcast %cst_23 : f32 to vector<128x128xf32>
    %34 = arith.mulf %33, %30 : vector<128x128xf32>
    %35 = arith.select %32, %30, %34 : vector<128x128xi1>, vector<128x128xf32>
    %c0_24 = arith.constant 0 : index
    %c0_25 = arith.constant 0 : index
    %36 = vector.load %arg9[%c0_24, %c0_25] : memref<1x128xf32, #tpu.memory_space<vmem>>, vector<1x128xf32>
    %37 = vector.broadcast %36 : vector<1x128xf32> to vector<128x128xf32>
    %38 = arith.mulf %35, %37 : vector<128x128xf32>
    %cst_26 = arith.constant dense<0.000000e+00> : vector<128xf32>
    %39 = vector.multi_reduction <add>, %38, %cst_26 [1] : vector<128x128xf32> to vector<128xf32>
    %40 = vector.shape_cast %39 : vector<128xf32> to vector<128x1xf32>
    %c0_27 = arith.constant 0 : index
    %c0_28 = arith.constant 0 : index
    %41 = vector.load %arg10[%c0_27, %c0_28] : memref<1x1xf32, #tpu.memory_space<vmem>>, vector<1x1xf32>
    %42 = vector.broadcast %41 : vector<1x1xf32> to vector<128x1xf32>
    %43 = arith.addf %40, %42 : vector<128x1xf32>
    %c0_29 = arith.constant 0 : index
    %c0_30 = arith.constant 0 : index
    %44 = vector.load %arg11[%c0_29, %c0_30] : memref<128x1xf32, #tpu.memory_space<vmem>>, vector<128x1xf32>
    tpu.vector_store %arg11[%c0_29, %c0_30], %43 {strides = array<i32>} : memref<128x1xf32, #tpu.memory_space<vmem>>, vector<128x1xf32>,
    return
  }
  func.func @transform_0(%arg0: i32) -> (i32, i32) {
    %c0_i32 = arith.constant 0 : i32
    %c0_i32_0 = arith.constant 0 : i32
    return %arg0, %c0_i32 : i32, i32
  }
  func.func @transform_1(%arg0: i32) -> (i32, i32) {
    %c0_i32 = arith.constant 0 : i32
    %c0_i32_0 = arith.constant 0 : i32
    %c0_i32_1 = arith.constant 0 : i32
    return %c0_i32, %c0_i32_0 : i32, i32
  }
  func.func @transform_2(%arg0: i32) -> (i32, i32) {
    %c0_i32 = arith.constant 0 : i32
    %c0_i32_0 = arith.constant 0 : i32
    %c0_i32_1 = arith.constant 0 : i32
    return %c0_i32, %c0_i32_0 : i32, i32
  }
  func.func @transform_3(%arg0: i32) -> (i32, i32) {
    %c0_i32 = arith.constant 0 : i32
    %c0_i32_0 = arith.constant 0 : i32
    %c0_i32_1 = arith.constant 0 : i32
    return %c0_i32, %c0_i32_0 : i32, i32
  }
  func.func @transform_4(%arg0: i32) -> (i32, i32) {
    %c0_i32 = arith.constant 0 : i32
    %c0_i32_0 = arith.constant 0 : i32
    %c0_i32_1 = arith.constant 0 : i32
    return %c0_i32, %c0_i32_0 : i32, i32
  }
  func.func @transform_5(%arg0: i32) -> (i32, i32) {
    %c0_i32 = arith.constant 0 : i32
    %c0_i32_0 = arith.constant 0 : i32
    %c0_i32_1 = arith.constant 0 : i32
    return %c0_i32, %c0_i32_0 : i32, i32
  }
  func.func @transform_6(%arg0: i32) -> (i32, i32) {
    %c0_i32 = arith.constant 0 : i32
    %c0_i32_0 = arith.constant 0 : i32
    %c0_i32_1 = arith.constant 0 : i32
    return %c0_i32, %c0_i32_0 : i32, i32
  }
  func.func @transform_7(%arg0: i32) -> (i32, i32) {
    %c0_i32 = arith.constant 0 : i32
    %c0_i32_0 = arith.constant 0 : i32
    %c0_i32_1 = arith.constant 0 : i32
    return %c0_i32, %c0_i32_0 : i32, i32
  }
  func.func @transform_8(%arg0: i32) -> (i32, i32) {
    %c0_i32 = arith.constant 0 : i32
    %c0_i32_0 = arith.constant 0 : i32
    %c0_i32_1 = arith.constant 0 : i32
    return %c0_i32, %c0_i32_0 : i32, i32
  }
  func.func @transform_9(%arg0: i32) -> (i32, i32) {
    %c0_i32 = arith.constant 0 : i32
    %c0_i32_0 = arith.constant 0 : i32
    %c0_i32_1 = arith.constant 0 : i32
    return %c0_i32, %c0_i32_0 : i32, i32
  }
  func.func @transform_10(%arg0: i32) -> (i32, i32) {
    %c0_i32 = arith.constant 0 : i32
    %c0_i32_0 = arith.constant 0 : i32
    return %arg0, %c0_i32 : i32, i32
  }
}

</mosaic_0001>

<bundles_post_ra>
// kernel: tpu_custom_call.1
= control target key start
LH: loop header
LB: loop body
LE: loop exit
PB: predicated region body
PF: predicated region fallthrough
CT: control target
= control target key end

     0   :  { %s3359_s0 = inlined_call_operand.hbm [shape: bf16[256,128], index: 0, kind: input, shape index: {}]   ;;  %s3360_s1 = inlined_call_operand.hbm [shape: bf16[128,256], index: 1, kind: input, shape index: {}]   ;;  %s3361_s2 = inlined_call_operand.vmem [shape: f32[1,256], index: 2, kind: input, shape index: {}]   ;;  %s3362_s3 = inlined_call_operand.hbm [shape: bf16[256,256], index: 3, kind: input, shape index: {}]   ;;  %s3363_s4 = inlined_call_operand.hbm [shape: bf16[128,256], index: 4, kind: input, shape index: {}]   ;;  %s3364_s5 = inlined_call_operand.vmem [shape: f32[1,256], index: 5, kind: input, shape index: {}]   ;;  %s3365_s6 = inlined_call_operand.hbm [shape: bf16[256,128], index: 6, kind: input, shape index: {}]   ;;  %s3366_s7 = inlined_call_operand.vmem [shape: f32[1,128], index: 7, kind: input, shape index: {}]   ;;  %s3367_s8 = inlined_call_operand.vmem [shape: f32[1,128], index: 8, kind: input, shape index: {}]   ;;  %s3368_s9 = inlined_call_operand.<no memory space> [shape: f32[1,1], index: 9, kind: input, shape index: {}]   ;;  %s3369_s10 = inlined_call_operand.vmem [shape: f32[256,1], index: 10, kind: output, shape index: {}]  }
   0x1   :  { %3373 = sst [smem:[#allocation14_spill]] %s3360_s1  ;;  %v15_v0 = vstv %s3368_s9 }
   0x2   :  { %16 = vst [vmem:[#allocation2] sm:$0x1] %v15_v0 }
   0x3   :  { %17 = vsyncpa [#allocation4], 0 }
   0x4   :  { %19 = vsyncpa [#allocation4 + $0x1], 0 }
   0x5   :  { %20 = vsyncpa [#allocation6], 0 }
   0x6   :  { %21 = vsyncpa [#allocation9], 0  ;;  %s2857_s15 = smov 0   ;;  %s2859_s16 = smov 0  }
   0x7   :  { %s2861_s17 = smov 0   ;;  %s2863_s18 = smov 0  }
   0x8 LB: > { %s3370_s9 = sadd.s32 4294967295, %s2789_s18   ;;  %p47_p0 = scmp.ne.s32.totalorder %s2781_s16, %s2777_s15  ;;  %s2789_s18 = sphi %s2863_s18, %s3386_s18   ;;  %s2785_s17 = sphi %s2861_s17, %s3385_s17   ;;  %s2781_s16 = sphi %s2859_s16, %s3384_s16   ;;  %s2777_s15 = sphi %s2857_s15, %s3383_s15  }
   0x9   : > { %p2879_p1 = scmp.eq.s32.totalorder %s3370_s9, 0  ;;  %p2034_p2 = scmp.ge.s32.totalorder %s2789_s18, 1 }
   0xa   : > { %p273_p3 = scmp.lt.s32.totalorder %s2789_s18, 3  ;;  %s3376_s1 = sld [smem:[#allocation14_spill]] }
   0xb   : > { %p2887_p4 = por %p2879_p1, %p47_p0  ;;  %s2791_s25 = smov [#allocation5]  }
   0xc   : > { %p2894_p5 = pnand %p2034_p2, %p273_p3  ;;  %s286_s26 = sshll.u32 %s2791_s25, 4  ;;  %s287_s26 = int_to_ptr.vmem [resolvable:$true] %s286_s26 }
   0xd   : > { %s315_s30 = sshll.u32 %s3363_s4, 4  ;;  %s2792_s11 = smov 128   ;;  %s316_s30 = int_to_ptr.hbm [resolvable:$true] %s315_s30 }
   0xe   : > { %p2528_p6 = pneg %p2894_p5  ;;  %s2793_s12 = smov 8  }
   0xf   : > { %s2794_s13 = smov [#allocation8]   ;;  %s301_s22 = sshll.u32 %s3362_s3, 4  ;;  %s302_s22 = int_to_ptr.hbm [resolvable:$true] %s301_s22 }
  0x10   : > { %s284_s23 = sshll.u32 %s3376_s1, 4  ;;  %p2902_p7 = pnand %p2528_p6, %p2879_p1  ;;  %s285_s23 = int_to_ptr.hbm [resolvable:$true] %s284_s23 }
  0x11   : > { %s317_s14 = sshll.u32 %s2794_s13, 4  ;;  %s332_s29 = sshll.u32 %s3365_s6, 4  ;;  %s318_s14 = int_to_ptr.vmem [resolvable:$true] %s317_s14  ;;  %s333_s29 = int_to_ptr.hbm [resolvable:$true] %s332_s29 }
  0x12   : > { %2531 = dma.hbm_to_vmem [thread:$0]  (!%p2902_p7), %s285_s23, 2048, %s287_s26, [#allocation6], %s2792_s11, %s2792_s11, %s2793_s12  }
  0x13   : > { %2537 = dma.hbm_to_vmem [thread:$0]  (!%p2902_p7), %s316_s30, 2048, %s318_s14, [#allocation9], %s2792_s11, %s2792_s11, %s2793_s12  }
  0x14   : > { %s2795_s23 = smov [#allocation7]   ;;  %s2796_s13 = smov [#allocation10]  }
  0x15   : > { %s303_s26 = sshll.u32 %s2795_s23, 4  ;;  %s334_s30 = sshll.u32 %s2796_s13, 4  ;;  %s304_s26 = int_to_ptr.vmem [resolvable:$true] %s303_s26  ;;  %s335_s30 = int_to_ptr.vmem [resolvable:$true] %s334_s30 }
  0x16   : > { %2534 = dma.hbm_to_vmem [thread:$0]  (!%p2902_p7), %s302_s22, 4096, %s304_s26, [#allocation6], %s2792_s11, %s2792_s11, %s2793_s12  }
  0x17   : > { %s3371_s14 = smov 64   ;;  %s3372_s15 = smov 4  }
  0x18   : > { %2540 = dma.hbm_to_vmem [thread:$0]  (!%p2902_p7), %s333_s29, 2048, %s335_s30, [#allocation9], %s3371_s14, %s3371_s14, %s3372_s15  }
  0x19   : > { %s2927_s21 = sadd.s32 1, %s2789_s18   ;;  %s34_s28 = sadd.s32 1, %s2785_s17 }
  0x1a   : > { %s31_s25 = ssub.s32 %s2789_s18, %s2927_s21  ;;  %p41_p9 = scmp.ne.s32.totalorder %s2785_s17, %s2781_s16 }
  0x1b   : > { %p32_p8 = scmp.eq.s32.totalorder %s31_s25, 0  ;;  %p42_p10 = scmp.eq.s32.totalorder %s2789_s18, 0 }
  0x1c   : > { %s357_s12 = sand.u32 1, %s2785_s17   ;;  %s2405_s22 = sshll.u32 %s2789_s18, 6 }
  0x1d   : > { %s2936_s11 = scalar_select %p32_p8, %s2785_s17, %s34_s28  }
  0x1e   : > { %p43_p11 = por %p42_p10, %p41_p9  ;;  %p2549_p12 = scmp.lt.s32.totalorder %s2789_s18, 2 }
  0x1f   : > { %s2040_s23 = sshll.u32 %s357_s12, 6  ;;  %s366_s13 = scalar_lea.hbm %s3359_s0, %s2405_s22 }
  0x20   : > { %s367_s29 = sshll.u32 %s366_s13, 4  ;;  %s361_s30 = scalar_lea.vmem [#allocation3], %s2040_s23  ;;  %s368_s29 = int_to_ptr.hbm [resolvable:$true] %s367_s29 }
  0x21   : > { %s369_s9 = sshll.u32 %s361_s30, 4  ;;  %p2944_p13 = pnand %p2549_p12, %p43_p11  ;;  %s370_s9 = int_to_ptr.vmem [resolvable:$true] %s369_s9 }
  0x22   : > { %s358_s28 = scalar_lea.sflag [#allocation4], %s357_s12  ;;  %s2717_s14 = sshra.s32 %s368_s29, 4  ;;  %s2718_s14 = int_to_ptr.hbm [resolvable:$true] %s2717_s14 }
  0x23   : > { %s2719_s15 = scalar_lea.hbm %s2718_s14, 64  ;;  %p2721_p2 = pneg %p2944_p13 }
  0x24   : > { %p2720_p0 = scmp.ne.s32.totalorder %s2718_s14, %s2719_s15  ;;  %s2724_s23 = scalar_lea.hbm %s3359_s0, 128 }
  0x25   : > { %p2725_p7 = scmp.lt.s32.totalorder %s2718_s14, %s3359_s0  ;;  %p2726_p8 = scmp.lt.s32.totalorder %s2724_s23, %s2719_s15 }
  0x26   : > { %p2722_p3 = pnand %p2721_p2, %p2720_p0 }
  0x27   : > { %p2727_p9 = por %p2726_p8, %p2725_p7 }
  0x28   : > { %p2723_p6 = pneg %p2722_p3 }
  0x2a   : > { %p2728_p10 = pnand %p2727_p9, %p2723_p6 }
  0x2c   : > { %2731 = shalt.err (!%p2728_p10)
}
  0x2d   : > { %s3380_s12 = smov 4   ;;  %s3381_s30 = smov 64  }
  0x2e   : > { %2544 = dma.hbm_to_vmem [thread:$0]  (!%p2944_p13), %s368_s29, 1024, %s370_s9, %s358_s28, %s3381_s30, %s3381_s30, %s3380_s12  }
  0x2f   : > { %381 = sbr.rel (%p2894_p5) target bundleno = 807 (0x327), region = 60  ;;  %s383_s22 = sand.u32 (!%p2894_p5), 1, %s2781_s16  }
  0x30   : > { %s2044_s27 = sshll.u32 (!%p2894_p5), %s383_s22, 6  ;;  %s384_s1 = scalar_lea.sflag (!%p2894_p5), [#allocation4], %s383_s22 }
  0x31   : > { %s2964_s26 = scalar_lea.vmem (!%p2894_p5), [#allocation3], %s2044_s27 }
  0x34   : > { %2764 = dma.done.wait (%p2887_p4), %s384_s1, 1024  }
  0x35   : > { %2766 = vsyncadd (%p2887_p4), %s384_s1, 4294966272 }
  0x36   : > { %2768 = dma.done.wait (%p2879_p1), [#allocation6], 6144  }
  0x37   : > { %2770 = vsyncadd (%p2879_p1), [#allocation6], 4294961152 }
  0x38   : > { %2772 = dma.done.wait (%p2879_p1), [#allocation9], 4096  }
  0x39   : > { %2774 = vsyncadd (%p2879_p1), [#allocation9], 4294963200  ;;  %v2141_v1 = vld [vmem:[#allocation5 + $0x70] sm:$0xf]  ;;  %v2429_v2 = vld [vmem:[#allocation5 + $0x74] sm:$0xf0] }
  0x3a   : > { %v2428_v3 = vld [vmem:[#allocation5 + $0x74] sm:$0xf]  ;;  %v2142_v4 = vor.u32 %v2429_v2, %v2141_v1  ;;  %v2143_v5 = vld [vmem:[#allocation5 + $0x78] sm:$0xf0]  ;;  %v2133_v6 = vld [vmem:[#allocation5 + $0x60] sm:$0xf] }
  0x3b   : > { %v2427_v7 = vld [vmem:[#allocation5 + $0x64] sm:$0xf0]  ;;  %v2146_v8 = vor.u32 %v2428_v3, %v2143_v5  ;;  %v2426_v9 = vld [vmem:[#allocation5 + $0x64] sm:$0xf]  ;;  %v2135_v10 = vld [vmem:[#allocation5 + $0x68] sm:$0xf0] }
  0x3c   : > { %618 = vmatpush.bf16.msra.mxu0 %v2142_v4  ;;  %2494 = vmatpush.bf16.msra.mxu2 %v2142_v4  ;;  %v2134_v11 = vor.u32 %v2427_v7, %v2133_v6  ;;  %v2138_v12 = vor.u32 %v2426_v9, %v2135_v10  ;;  %v2125_v13 = vld [vmem:[#allocation5 + $0x50] sm:$0xf]  ;;  %v2425_v14 = vld [vmem:[#allocation5 + $0x54] sm:$0xf0]  ;;  %v2424_v15 = vld [vmem:[#allocation5 + $0x54] sm:$0xf] }
  0x3d   : > { %667 = vmatpush.bf16.msra.mxu1 %v2146_v8  ;;  %2502 = vmatpush.bf16.msra.mxu3 %v2146_v8  ;;  %v2127_v16 = vld [vmem:[#allocation5 + $0x58] sm:$0xf0]  ;;  %v2126_v17 = vor.u32 %v2425_v14, %v2125_v13  ;;  %v2117_v19 = vld [vmem:[#allocation5 + $0x40] sm:$0xf]  ;;  %v2423_v20 = vld [vmem:[#allocation5 + $0x44] sm:$0xf0] }
  0x3e   : > { %v2130_v18 = vor.u32 %v2424_v15, %v2127_v16  ;;  %v2422_v21 = vld [vmem:[#allocation5 + $0x44] sm:$0xf]  ;;  %v2119_v22 = vld [vmem:[#allocation5 + $0x48] sm:$0xf0]  ;;  %v2118_v23 = vor.u32 %v2423_v20, %v2117_v19  ;;  %v2109_v25 = vld [vmem:[#allocation5 + $0x30] sm:$0xf] }
  0x3f   : > { %v2122_v24 = vor.u32 %v2422_v21, %v2119_v22  ;;  %v2421_v26 = vld [vmem:[#allocation5 + $0x34] sm:$0xf0]  ;;  %v2420_v27 = vld [vmem:[#allocation5 + $0x34] sm:$0xf]  ;;  %v2111_v28 = vld [vmem:[#allocation5 + $0x38] sm:$0xf0] }
  0x40   : > { %619 = vmatpush.bf16.msra.mxu0 %v2134_v11  ;;  %2495 = vmatpush.bf16.msra.mxu2 %v2134_v11  ;;  %v2110_v29 = vor.u32 %v2421_v26, %v2109_v25  ;;  %v2114_v30 = vor.u32 %v2420_v27, %v2111_v28  ;;  %v2101_v31 = vld [vmem:[#allocation5 + $0x20] sm:$0xf]  ;;  %v2419_v32 = vld [vmem:[#allocation5 + $0x24] sm:$0xf0]  ;;  %v2418_v33 = vld [vmem:[#allocation5 + $0x24] sm:$0xf] }
  0x41   : > { %668 = vmatpush.bf16.msra.mxu1 %v2138_v12  ;;  %2503 = vmatpush.bf16.msra.mxu3 %v2138_v12  ;;  %v2103_v34 = vld [vmem:[#allocation5 + $0x28] sm:$0xf0]  ;;  %v2102_v35 = vor.u32 %v2419_v32, %v2101_v31  ;;  %v2093_v37 = vld [vmem:[#allocation5 + $0x10] sm:$0xf]  ;;  %v2417_v38 = vld [vmem:[#allocation5 + $0x14] sm:$0xf0] }
  0x42   : > { %v2106_v36 = vor.u32 %v2418_v33, %v2103_v34  ;;  %v2416_v39 = vld [vmem:[#allocation5 + $0x14] sm:$0xf]  ;;  %v2095_v40 = vld [vmem:[#allocation5 + $0x18] sm:$0xf0]  ;;  %v2094_v41 = vor.u32 %v2417_v38, %v2093_v37  ;;  %v2085_v43 = vld [vmem:[#allocation5] sm:$0xf] }
  0x43   : > { %v2098_v42 = vor.u32 %v2416_v39, %v2095_v40  ;;  %v2415_v44 = vld [vmem:[#allocation5 + $0x4] sm:$0xf0]  ;;  %v2414_v45 = vld [vmem:[#allocation5 + $0x4] sm:$0xf]  ;;  %v2087_v46 = vld [vmem:[#allocation5 + $0x8] sm:$0xf0] }
  0x44   : > { %620 = vmatpush.bf16.msra.mxu0 %v2126_v17  ;;  %2496 = vmatpush.bf16.msra.mxu2 %v2126_v17  ;;  %v2205_v47 = vld [vmem:[#allocation8 + $0x70] sm:$0xf]  ;;  %v2445_v48 = vld [vmem:[#allocation8 + $0x74] sm:$0xf0]  ;;  %v2444_v49 = vld [vmem:[#allocation8 + $0x74] sm:$0xf]  ;;  %v2086_v51 = vor.u32 %v2415_v44, %v2085_v43  ;;  %v2090_v52 = vor.u32 %v2414_v45, %v2087_v46 }
  0x45   : > { %669 = vmatpush.bf16.msra.mxu1 %v2130_v18  ;;  %2504 = vmatpush.bf16.msra.mxu3 %v2130_v18  ;;  %v2207_v50 = vld [vmem:[#allocation8 + $0x78] sm:$0xf0]  ;;  %v2979_v53 = vld [vmem:[%s2964_s26] sm:$0xff]  ;;  %v2206_v55 = vor.u32 %v2445_v48, %v2205_v47  ;;  %v2443_v58 = vld [vmem:[#allocation8 + $0x64] sm:$0xf0]  ;;  %s3382_s25 = sadd.s32 4294967295, %s2789_s18  }
  0x46   : > { %v2982_v54 = vld [vmem:[%s2964_s26 + $0x20] sm:$0xff]  ;;  %v2210_v56 = vor.u32 %v2444_v49, %v2207_v50  ;;  %v2199_v60 = vld [vmem:[#allocation8 + $0x68] sm:$0xf0]  ;;  %v2189_v63 = vld [vmem:[#allocation8 + $0x50] sm:$0xf]  ;;  %s2049_s28 = sshll.u32 %s3382_s25, 4 }
  0x47   : > { %v2197_v57 = vld [vmem:[#allocation8 + $0x60] sm:$0xf]  ;;  %v2442_v59 = vld [vmem:[#allocation8 + $0x64] sm:$0xf]  ;;  %v2441_v0 = vld [vmem:[#allocation8 + $0x54] sm:$0xf0] }
  0x48   : > { %621 = vmatpush.bf16.msra.mxu0 %v2118_v23  ;;  %2497 = vmatpush.bf16.msra.mxu2 %v2118_v23  ;;  %v2198_v61 = vor.u32 %v2443_v58, %v2197_v57  ;;  %v2202_v62 = vor.u32 %v2442_v59, %v2199_v60  ;;  %v2440_v1 = vld [vmem:[#allocation8 + $0x54] sm:$0xf]  ;;  %v2191_v2 = vld [vmem:[#allocation8 + $0x58] sm:$0xf0]  ;;  %v2190_v3 = vor.u32 %v2441_v0, %v2189_v63  ;;  %v2181_v5 = vld [vmem:[#allocation8 + $0x40] sm:$0xf] }
  0x49   : > { %670 = vmatpush.bf16.msra.mxu1 %v2122_v24  ;;  %2505 = vmatpush.bf16.msra.mxu3 %v2122_v24  ;;  %v2194_v4 = vor.u32 %v2440_v1, %v2191_v2  ;;  %v2439_v6 = vld [vmem:[#allocation8 + $0x44] sm:$0xf0]  ;;  %v2438_v7 = vld [vmem:[#allocation8 + $0x44] sm:$0xf]  ;;  %v2183_v8 = vld [vmem:[#allocation8 + $0x48] sm:$0xf0] }
  0x4a   : > { %v2182_v9 = vor.u32 %v2439_v6, %v2181_v5  ;;  %v2186_v10 = vor.u32 %v2438_v7, %v2183_v8  ;;  %v2173_v11 = vld [vmem:[#allocation8 + $0x30] sm:$0xf]  ;;  %v2437_v12 = vld [vmem:[#allocation8 + $0x34] sm:$0xf0]  ;;  %v2436_v13 = vld [vmem:[#allocation8 + $0x34] sm:$0xf] }
  0x4b   : > { %v2175_v14 = vld [vmem:[#allocation8 + $0x38] sm:$0xf0]  ;;  %v2989_v15 = vld [vmem:[%s2964_s26 + $0x8] sm:$0xff]  ;;  %v2174_v17 = vor.u32 %v2437_v12, %v2173_v11  ;;  %v2165_v19 = vld [vmem:[#allocation8 + $0x20] sm:$0xf]  ;;  %p447_p1 = scmp.lt.s32.totalorder %s2049_s28, 31 }
  0x4c   : > { %622 = vmatpush.bf16.msra.mxu0 %v2110_v29  ;;  %2498 = vmatpush.bf16.msra.mxu2 %v2110_v29  ;;  %v2992_v16 = vld [vmem:[%s2964_s26 + $0x28] sm:$0xff]  ;;  %v2178_v18 = vor.u32 %v2436_v13, %v2175_v14  ;;  %v2434_v21 = vld [vmem:[#allocation8 + $0x24] sm:$0xf]  ;;  %v2157_v25 = vld [vmem:[#allocation8 + $0x10] sm:$0xf] }
  0x4d   : > { %671 = vmatpush.bf16.msra.mxu1 %v2114_v30  ;;  %2506 = vmatpush.bf16.msra.mxu3 %v2114_v30  ;;  %v2435_v20 = vld [vmem:[#allocation8 + $0x24] sm:$0xf0]  ;;  %v2167_v22 = vld [vmem:[#allocation8 + $0x28] sm:$0xf0]  ;;  %v2433_v26 = vld [vmem:[#allocation8 + $0x14] sm:$0xf0] }
  0x4e   : > { %v2166_v23 = vor.u32 %v2435_v20, %v2165_v19  ;;  %v2170_v24 = vor.u32 %v2434_v21, %v2167_v22  ;;  %v2432_v27 = vld [vmem:[#allocation8 + $0x14] sm:$0xf]  ;;  %v2159_v28 = vld [vmem:[#allocation8 + $0x18] sm:$0xf0]  ;;  %v2158_v29 = vor.u32 %v2433_v26, %v2157_v25  ;;  %v2149_v31 = vld [vmem:[#allocation8] sm:$0xf] }
  0x4f   : > { %v2162_v30 = vor.u32 %v2432_v27, %v2159_v28  ;;  %v2431_v32 = vld [vmem:[#allocation8 + $0x4] sm:$0xf0]  ;;  %v2430_v33 = vld [vmem:[#allocation8 + $0x4] sm:$0xf]  ;;  %v2151_v34 = vld [vmem:[#allocation8 + $0x8] sm:$0xf0] }
  0x50   : > { %623 = vmatpush.bf16.msra.mxu0 %v2102_v35  ;;  %2499 = vmatpush.bf16.msra.mxu2 %v2102_v35  ;;  %v2150_v35 = vor.u32 %v2431_v32, %v2149_v31  ;;  %v2999_v37 = vld [vmem:[%s2964_s26 + $0x10] sm:$0xff]  ;;  %v2271_v40 = vld [vmem:[#allocation7 + $0x78] sm:$0xf0]  ;;  %v2458_v47 = vld [vmem:[#allocation7 + $0x64] sm:$0xf]  ;;  %s3388_s28 = smov (!%p447_p1, %s2049_s28), 31 }
  0x51   : > { %672 = vmatpush.bf16.msra.mxu1 %v2106_v36  ;;  %2507 = vmatpush.bf16.msra.mxu3 %v2106_v36  ;;  %v2154_v36 = vor.u32 %v2430_v33, %v2151_v34  ;;  %v3002_v38 = vld [vmem:[%s2964_s26 + $0x30] sm:$0xff]  ;;  %v2335_v43 = vld [vmem:[#allocation7 + $0xf8] sm:$0xf0]  ;;  %v2263_v48 = vld [vmem:[#allocation7 + $0x68] sm:$0xf0]  ;;  %s2050_s18 = sshll.u32 %s3388_s28, 3 }
  0x52   : > { %v2460_v39 = vld [vmem:[#allocation7 + $0x74] sm:$0xf]  ;;  %v3009_v45 = vld [vmem:[%s2964_s26 + $0x18] sm:$0xff]  ;;  %v2474_v49 = vld [vmem:[#allocation7 + $0xe4] sm:$0xf]  ;;  %v2266_v50 = vor.u32 %v2458_v47, %v2263_v48  ;;  %s3311_s12 = scalar_lea.vmem %s3369_s10, %s2050_s18 }
  0x53   : > { %v3012_v46 = vld [vmem:[%s2964_s26 + $0x38] sm:$0xff]  ;;  %v2472_v57 = vld [vmem:[#allocation7 + $0xd4] sm:$0xf]  ;;  %v2269_v60 = vld [vmem:[#allocation7 + $0x70] sm:$0xf] }
  0x54   : > { %624 = vmatpush.bf16.msra.mxu0 %v2094_v41  ;;  %2500 = vmatpush.bf16.msra.mxu2 %v2094_v41  ;;  %v2476_v41 = vld [vmem:[#allocation7 + $0xf4] sm:$0xf]  ;;  %v2319_v59 = vld [vmem:[#allocation7 + $0xd8] sm:$0xf0]  ;;  %v2333_v0 = vld [vmem:[#allocation7 + $0xf0] sm:$0xf] }
  0x55   : > { %673 = vmatpush.bf16.msra.mxu1 %v2098_v42  ;;  %2508 = vmatpush.bf16.msra.mxu3 %v2098_v42  ;;  %v2274_v42 = vor.u32 %v2460_v39, %v2271_v40  ;;  %v2338_v44 = vor.u32 %v2476_v41, %v2335_v43  ;;  %v2477_v1 = vld [vmem:[#allocation7 + $0xf4] sm:$0xf0]  ;;  %v2454_v5 = vld [vmem:[#allocation7 + $0x44] sm:$0xf]  ;;  %v2247_v6 = vld [vmem:[#allocation7 + $0x48] sm:$0xf0] }
  0x56   : > { %v2334_v2 = vor.u32 %v2477_v1, %v2333_v0  ;;  %v2475_v8 = vld [vmem:[#allocation7 + $0xe4] sm:$0xf0]  ;;  %v2470_v11 = vld [vmem:[#allocation7 + $0xc4] sm:$0xf]  ;;  %v2311_v12 = vld [vmem:[#allocation7 + $0xc8] sm:$0xf0] }
  0x57   : > { %v2253_v13 = vld [vmem:[#allocation7 + $0x50] sm:$0xf]  ;;  %v2314_v14 = vor.u32 %v2470_v11, %v2311_v12  ;;  %v2473_v19 = vld [vmem:[#allocation7 + $0xd4] sm:$0xf0]  ;;  %v2245_v22 = vld [vmem:[#allocation7 + $0x40] sm:$0xf] }
  0x58   : > { %625 = vmatpush.bf16.msra.mxu0 %v2086_v51  ;;  %2501 = vmatpush.bf16.msra.mxu2 %v2086_v51  ;;  %v2327_v51 = vld [vmem:[#allocation7 + $0xe8] sm:$0xf0]  ;;  %v2237_v27 = vld [vmem:[#allocation7 + $0x30] sm:$0xf]  ;;  %v2453_v28 = vld [vmem:[#allocation7 + $0x34] sm:$0xf0] }
  0x59   : > { %674 = vmatpush.bf16.msra.mxu1 %v2090_v52  ;;  %2509 = vmatpush.bf16.msra.mxu3 %v2090_v52  ;;  %v2330_v52 = vor.u32 %v2474_v49, %v2327_v51  ;;  %v2469_v31 = vld [vmem:[#allocation7 + $0xb4] sm:$0xf0]  ;;  %v2229_v33 = vld [vmem:[#allocation7 + $0x20] sm:$0xf]  ;;  %v2451_v34 = vld [vmem:[#allocation7 + $0x24] sm:$0xf0] }
  0x5a   : > { %v2230_v39 = vor.u32 %v2451_v34, %v2229_v33  ;;  %v2293_v40 = vld [vmem:[#allocation7 + $0xa0] sm:$0xf]  ;;  %v2468_v43 = vld [vmem:[#allocation7 + $0xb4] sm:$0xf]  ;;  %v2221_v49 = vld [vmem:[#allocation7 + $0x10] sm:$0xf] }
  0x5b   : > { %626 = vmatmul.bf16.vlgmr.msra.gmra.mxu0 %v2979_v53  ;;  %646 = vmatmul.bf16.vlgmr.msra.gmra.mxu2 %v2982_v54  ;;  %v2285_v51 = vld [vmem:[#allocation7 + $0x90] sm:$0xf]  ;;  %v2466_v0 = vld [vmem:[#allocation7 + $0xa4] sm:$0xf]  ;;  %v2464_v11 = vld [vmem:[#allocation7 + $0x94] sm:$0xf] }
  0x5c   : > { %924 = vmatpush.bf16.msrb.mxu2 %v2206_v55  ;;  %675 = vmatmul.bf16.vlgmr.msra.gmra.mxu1 %v2979_v53  ;;  %v2456_v55 = vld [vmem:[#allocation7 + $0x54] sm:$0xf]  ;;  %v2287_v12 = vld [vmem:[#allocation7 + $0x98] sm:$0xf0] }
  0x5d   : > { %973 = vmatpush.bf16.msrb.mxu3 %v2210_v56  ;;  %v2255_v56 = vld [vmem:[#allocation7 + $0x58] sm:$0xf0]  ;;  %1263 = vmatpush.bf16.msrb.mxu1 %v2334_v2  ;;  %v2295_v2 = vld [vmem:[#allocation7 + $0xa8] sm:$0xf0] }
  0x5e   : > { %695 = vmatmul.bf16.vlgmr.msra.gmra.mxu3 %v2982_v54  ;;  %v2258_v58 = vor.u32 %v2456_v55, %v2255_v56  ;;  %v2465_v55 = vld [vmem:[#allocation7 + $0x94] sm:$0xf0]  ;;  %v2213_v56 = vld [vmem:[#allocation7] sm:$0xf] }
  0x60   : > { %925 = vmatpush.bf16.msrb.mxu2 %v2198_v61  ;;  %v2461_v61 = vld [vmem:[#allocation7 + $0x74] sm:$0xf0] }
  0x61   : > { %974 = vmatpush.bf16.msrb.mxu3 %v2202_v62  ;;  %v2322_v62 = vor.u32 %v2472_v57, %v2319_v59  ;;  %v2270_v63 = vor.u32 %v2461_v61, %v2269_v60  ;;  %v2447_v57 = vld [vmem:[#allocation7 + $0x4] sm:$0xf0] }
  0x62   : > { %v2214_v59 = vor.u32 %v2447_v57, %v2213_v56  ;;  %v2463_v60 = vld [vmem:[#allocation7 + $0x84] sm:$0xf0]  ;;  %v2215_v56 = vld [vmem:[#allocation7 + $0x8] sm:$0xf0]  ;;  %v2462_v57 = vld [vmem:[#allocation7 + $0x84] sm:$0xf] }
  0x63   : > { %1214 = vmatpush.bf16.msrb.mxu0 %v2270_v63  ;;  %v2231_v63 = vld [vmem:[#allocation7 + $0x28] sm:$0xf0] }
  0x64   : > { %926 = vmatpush.bf16.msrb.mxu2 %v2190_v3  ;;  %v2261_v3 = vld [vmem:[#allocation7 + $0x60] sm:$0xf] }
  0x65   : > { %975 = vmatpush.bf16.msrb.mxu3 %v2194_v4  ;;  %v2325_v4 = vld [vmem:[#allocation7 + $0xe0] sm:$0xf] }
  0x68   : > { %927 = vmatpush.bf16.msrb.mxu2 %v2182_v9  ;;  %v2250_v9 = vor.u32 %v2454_v5, %v2247_v6 }
  0x69   : > { %976 = vmatpush.bf16.msrb.mxu3 %v2186_v10  ;;  %v2326_v10 = vor.u32 %v2475_v8, %v2325_v4 }
  0x6b   : > { %631 = vmatmul.bf16.gmra.mxu0 %v2989_v15  ;;  %651 = vmatmul.bf16.gmra.mxu2 %v2992_v16 }
  0x6c   : > { %928 = vmatpush.bf16.msrb.mxu2 %v2174_v17  ;;  %680 = vmatmul.bf16.gmra.mxu1 %v2989_v15  ;;  %v2457_v17 = vld [vmem:[#allocation7 + $0x54] sm:$0xf0] }
  0x6d   : > { %977 = vmatpush.bf16.msrb.mxu3 %v2178_v18  ;;  %v2317_v18 = vld [vmem:[#allocation7 + $0xd0] sm:$0xf]  ;;  %1264 = vmatpush.bf16.msrb.mxu1 %v2326_v10  ;;  %v2254_v20 = vor.u32 %v2457_v17, %v2253_v13  ;;  %v2223_v10 = vld [vmem:[#allocation7 + $0x18] sm:$0xf0]  ;;  %v2290_v17 = vor.u32 %v2464_v11, %v2287_v12 }
  0x6e   : > { %700 = vmatmul.bf16.gmra.mxu3 %v2992_v16  ;;  %v2318_v21 = vor.u32 %v2473_v19, %v2317_v18 }
  0x70   : > { %929 = vmatpush.bf16.msrb.mxu2 %v2166_v23  ;;  %v2309_v23 = vld [vmem:[#allocation7 + $0xc0] sm:$0xf] }
  0x71   : > { %978 = vmatpush.bf16.msrb.mxu3 %v2170_v24  ;;  %v2471_v24 = vld [vmem:[#allocation7 + $0xc4] sm:$0xf0]  ;;  %1265 = vmatpush.bf16.msrb.mxu1 %v2318_v21 }
  0x72   : > { %v2310_v26 = vor.u32 %v2471_v24, %v2309_v23 }
  0x74   : > { %930 = vmatpush.bf16.msrb.mxu2 %v2158_v29  ;;  %v2301_v29 = vld [vmem:[#allocation7 + $0xb0] sm:$0xf] }
  0x75   : > { %979 = vmatpush.bf16.msrb.mxu3 %v2162_v30  ;;  %1266 = vmatpush.bf16.msrb.mxu1 %v2310_v26  ;;  %v2238_v30 = vor.u32 %v2453_v28, %v2237_v27  ;;  %v2302_v32 = vor.u32 %v2469_v31, %v2301_v29 }
  0x78   : > { %931 = vmatpush.bf16.msrb.mxu2 %v2150_v35  ;;  %v2452_v35 = vld [vmem:[#allocation7 + $0x34] sm:$0xf] }
  0x79   : > { %980 = vmatpush.bf16.msrb.mxu3 %v2154_v36  ;;  %1267 = vmatpush.bf16.msrb.mxu1 %v2302_v32  ;;  %v2239_v36 = vld [vmem:[#allocation7 + $0x38] sm:$0xf0] }
  0x7a   : > { %v2242_v41 = vor.u32 %v2452_v35, %v2239_v36 }
  0x7b   : > { %636 = vmatmul.bf16.gmra.mxu0 %v2999_v37  ;;  %656 = vmatmul.bf16.gmra.mxu2 %v3002_v38 }
  0x7c   : > { %685 = vmatmul.bf16.gmra.mxu1 %v2999_v37  ;;  %1312 = vmatpush.bf16.msra.mxu2 %v2274_v42  ;;  %v2467_v42 = vld [vmem:[#allocation7 + $0xa4] sm:$0xf0] }
  0x7d   : > { %1361 = vmatpush.bf16.msra.mxu3 %v2338_v44  ;;  %v2303_v44 = vld [vmem:[#allocation7 + $0xb8] sm:$0xf0]  ;;  %v2294_v47 = vor.u32 %v2467_v42, %v2293_v40 }
  0x7e   : > { %705 = vmatmul.bf16.gmra.mxu3 %v3002_v38  ;;  %v2306_v48 = vor.u32 %v2468_v43, %v2303_v44 }
  0x7f   : > { %1268 = vmatpush.bf16.msrb.mxu1 %v2294_v47 }
  0x80   : > { %1313 = vmatpush.bf16.msra.mxu2 %v2266_v50  ;;  %v2449_v50 = vld [vmem:[#allocation7 + $0x14] sm:$0xf0] }
  0x81   : > { %1362 = vmatpush.bf16.msra.mxu3 %v2330_v52  ;;  %v2222_v52 = vor.u32 %v2449_v50, %v2221_v49 }
  0x84   : > { %1314 = vmatpush.bf16.msra.mxu2 %v2258_v58  ;;  %v2277_v58 = vld [vmem:[#allocation7 + $0x80] sm:$0xf] }
  0x85   : > { %1363 = vmatpush.bf16.msra.mxu3 %v2322_v62  ;;  %v2278_v61 = vor.u32 %v2463_v60, %v2277_v58  ;;  %v2450_v62 = vld [vmem:[#allocation7 + $0x24] sm:$0xf]  ;;  %v2279_v58 = vld [vmem:[#allocation7 + $0x88] sm:$0xf0] }
  0x86   : > { %v2234_v1 = vor.u32 %v2450_v62, %v2231_v63  ;;  %v2282_v62 = vor.u32 %v2462_v57, %v2279_v58 }
  0x88   : > { %1315 = vmatpush.bf16.msra.mxu2 %v2250_v9  ;;  %v2448_v9 = vld [vmem:[#allocation7 + $0x14] sm:$0xf] }
  0x89   : > { %1364 = vmatpush.bf16.msra.mxu3 %v2314_v14  ;;  %v2226_v14 = vor.u32 %v2448_v9, %v2223_v10 }
  0x8b   : > { %641 = vmatmul.bf16.gmra.mxu0 %v3009_v45  ;;  %661 = vmatmul.bf16.gmra.mxu2 %v3012_v46 }
  0x8c   : > { %690 = vmatmul.bf16.gmra.mxu1 %v3009_v45  ;;  %1316 = vmatpush.bf16.msra.mxu2 %v2242_v41 }
  0x8d   : > { %1365 = vmatpush.bf16.msra.mxu3 %v2306_v48 }
  0x8e   : > { %710 = vmatmul.bf16.gmra.mxu3 %v3012_v46 }
  0x90   : > { %1317 = vmatpush.bf16.msra.mxu2 %v2234_v1 }
  0x94   : > { %1318 = vmatpush.bf16.msra.mxu2 %v2226_v14 }
  0x9b   : > { %932 = vmatmul.bf16.vlgmr.msrb.gmra.mxu2 %v2979_v53 }
  0x9e   : > { %981 = vmatmul.bf16.vlgmr.msrb.gmra.mxu3 %v2979_v53  ;;  %v2459_v53 = vld [vmem:[#allocation7 + $0x64] sm:$0xf0] }
  0x9f   : > { %v2262_v7 = vor.u32 %v2459_v53, %v2261_v3  ;;  %v2298_v3 = vor.u32 %v2466_v0, %v2295_v2  ;;  %v484_v53 = vld [vmem:[%s3361_s2] sm:$0x3] }
  0xa0   : > { %v3029_v5 = vperm.slane %v484_v53, 0 }
  0xa1   : > { %1215 = vmatpush.bf16.msrb.mxu0 %v2262_v7  ;;  %1366 = vmatpush.bf16.msra.mxu3 %v2298_v3  ;;  %v3031_v7 = vperm.slane %v484_v53, 1 }
  0xa5   : > { %1216 = vmatpush.bf16.msrb.mxu0 %v2254_v20  ;;  %1367 = vmatpush.bf16.msra.mxu3 %v2290_v17 }
  0xa9   : > { %1368 = vmatpush.bf16.msra.mxu3 %v2282_v62 }
  0xab   : > { %937 = vmatmul.bf16.gmra.mxu2 %v2989_v15 }
  0xae   : > { %986 = vmatmul.bf16.gmra.mxu3 %v2989_v15  ;;  %v2455_v15 = vld [vmem:[#allocation7 + $0x44] sm:$0xf0] }
  0xaf   : > { %v2246_v25 = vor.u32 %v2455_v15, %v2245_v22 }
  0xb1   : > { %1217 = vmatpush.bf16.msrb.mxu0 %v2246_v25 }
  0xb5   : > { %1218 = vmatpush.bf16.msrb.mxu0 %v2238_v30 }
  0xb9   : > { %1219 = vmatpush.bf16.msrb.mxu0 %v2230_v39 }
  0xbb   : > { %942 = vmatmul.bf16.gmra.mxu2 %v2999_v37 }
  0xbd   : > { %1220 = vmatpush.bf16.msrb.mxu0 %v2222_v52 }
  0xbe   : > { %991 = vmatmul.bf16.gmra.mxu3 %v2999_v37  ;;  %v2286_v37 = vor.u32 %v2465_v55, %v2285_v51  ;;  %v2446_v51 = vld [vmem:[#allocation7 + $0x4] sm:$0xf] }
  0xc0   : > { %1269 = vmatpush.bf16.msrb.mxu1 %v2286_v37 }
  0xc1   : > { %1221 = vmatpush.bf16.msrb.mxu0 %v2214_v59 }
  0xc4   : > { %1270 = vmatpush.bf16.msrb.mxu1 %v2278_v61  ;;  %v2218_v61 = vor.u32 %v2446_v51, %v2215_v56 }
  0xc6   : > { %1319 = vmatpush.bf16.msra.mxu2 %v2218_v61 }
  0xcb   : > { %947 = vmatmul.bf16.gmra.mxu2 %v3009_v45 }
  0xce   : > { %996 = vmatmul.bf16.gmra.mxu3 %v3009_v45 }
  0xd8   : > { %v627_v4 = vpop.f32.mrf.mxu0 }
  0xd9   : > { %v676_v6 = vpop.f32.mrf.mxu1  ;;  %v628_v45 = vadd.f32 %v627_v4, %v3029_v5 }
  0xda   : > { %v677_v8 = vadd.f32 %v676_v6, %v3031_v7 }
  0xdb   : > { %952 = vmatmul.bf16.gmra.mxu2 %v2982_v54  ;;  %v748_v18 = vmul.f32 0.01, %v628_v45  ;;  %vm716_vm0 = vcmp.gt.f32.partialorder %v628_v45, 0.0 }
  0xdc   : > { %v749_v21 = vmul.f32 0.01, %v677_v8  ;;  %vm717_vm1 = vcmp.gt.f32.partialorder %v677_v8, 0.0 }
  0xdd   : > { %v780_v26 = vsel %vm716_vm0, %v628_v45, %v748_v18 }
  0xde   : > { %1001 = vmatmul.bf16.gmra.mxu3 %v2982_v54  ;;  %v647_v13 = vpop.f32.mrf.mxu2  ;;  %v781_v28 = vsel %vm717_vm1, %v677_v8, %v749_v21 }
  0xdf   : > { %v648_v19 = vadd.f32 %v647_v13, %v3029_v5 }
  0xe0   : > { %v629_v15 = vpop.f32.mrf.mxu0 }
  0xe1   : > { %v696_v20 = vpop.f32.mrf.mxu3  ;;  %v630_v54 = vadd.f32 %v629_v15, %v3029_v5  ;;  %v678_v23 = vpop.f32.mrf.mxu1  ;;  %v764_v33 = vmul.f32 0.01, %v648_v19  ;;  %vm732_vm4 = vcmp.gt.f32.partialorder %v648_v19, 0.0 }
  0xe2   : > { %v697_v22 = vadd.f32 %v696_v20, %v3031_v7  ;;  %v679_v24 = vadd.f32 %v678_v23, %v3031_v7 }
  0xe3   : > { %vm718_vm2 = vcmp.gt.f32.partialorder %v630_v54, 0.0  ;;  %v750_v25 = vmul.f32 0.01, %v630_v54  ;;  %v796_v48 = vsel %vm732_vm4, %v648_v19, %v764_v33 }
  0xe4   : > { %vm719_vm3 = vcmp.gt.f32.partialorder %v679_v24, 0.0  ;;  %v751_v27 = vmul.f32 0.01, %v679_v24  ;;  %v765_v39 = vmul.f32 0.01, %v697_v22  ;;  %vm733_vm6 = vcmp.gt.f32.partialorder %v697_v22, 0.0 }
  0xe5   : > { %v782_v29 = vsel %vm718_vm2, %v630_v54, %v750_v25 }
  0xe6   : > { %v649_v30 = vpop.f32.mrf.mxu2  ;;  %v3041_v31 = vpack.c.bf16 %v782_v29, %v780_v26  ;;  %v783_v32 = vsel %vm719_vm3, %v679_v24, %v751_v27  ;;  %v797_v55 = vsel %vm733_vm6, %v697_v22, %v765_v39 }
  0xe7   : > { %v650_v34 = vadd.f32 %v649_v30, %v3029_v5  ;;  %v3044_v36 = vpack.c.bf16 %v783_v32, %v781_v28 }
  0xe8   : > { %v632_v41 = vpop.f32.mrf.mxu0  ;;  %1222 = vmatmul.bf16.vlgmr.msrb.gmra.mxu0 %v3041_v31 }
  0xe9   : > { %v698_v35 = vpop.f32.mrf.mxu3  ;;  %v766_v42 = vmul.f32 0.01, %v650_v34  ;;  %v681_v43 = vpop.f32.mrf.mxu1  ;;  %1271 = vmatmul.bf16.vlgmr.msrb.gmra.mxu1 %v3044_v36  ;;  %vm734_vm5 = vcmp.gt.f32.partialorder %v650_v34, 0.0  ;;  %v633_v47 = vadd.f32 %v632_v41, %v3029_v5 }
  0xea   : > { %v699_v40 = vadd.f32 %v698_v35, %v3031_v7  ;;  %v682_v50 = vadd.f32 %v681_v43, %v3031_v7 }
  0xeb   : > { %957 = vmatmul.bf16.gmra.mxu2 %v2992_v16  ;;  %v798_v49 = vsel %vm734_vm5, %v650_v34, %v766_v42  ;;  %v752_v63 = vmul.f32 0.01, %v633_v47  ;;  %vm720_vm8 = vcmp.gt.f32.partialorder %v633_v47, 0.0 }
  0xec   : > { %v767_v44 = vmul.f32 0.01, %v699_v40  ;;  %vm735_vm7 = vcmp.gt.f32.partialorder %v699_v40, 0.0  ;;  %v3053_v52 = vpack.c.bf16 %v798_v49, %v796_v48  ;;  %v753_v2 = vmul.f32 0.01, %v682_v50 }
  0xed   : > { %vm721_vm9 = vcmp.gt.f32.partialorder %v682_v50, 0.0  ;;  %v784_v8 = vsel %vm720_vm8, %v633_v47, %v752_v63 }
  0xee   : > { %1006 = vmatmul.bf16.gmra.mxu3 %v2992_v16  ;;  %v799_v37 = vsel %vm735_vm7, %v699_v40, %v767_v44  ;;  %v652_v60 = vpop.f32.mrf.mxu2  ;;  %v785_v10 = vsel %vm721_vm9, %v682_v50, %v753_v2 }
  0xef   : > { %v3055_v59 = vpack.c.bf16 %v799_v37, %v797_v55  ;;  %v653_v0 = vadd.f32 %v652_v60, %v3029_v5 }
  0xf0   : > { %v634_v3 = vpop.f32.mrf.mxu0 }
  0xf1   : > { %v701_v1 = vpop.f32.mrf.mxu3  ;;  %v635_v53 = vadd.f32 %v634_v3, %v3029_v5  ;;  %v683_v4 = vpop.f32.mrf.mxu1  ;;  %v768_v17 = vmul.f32 0.01, %v653_v0  ;;  %vm736_vm12 = vcmp.gt.f32.partialorder %v653_v0, 0.0 }
  0xf2   : > { %v702_v16 = vadd.f32 %v701_v1, %v3031_v7  ;;  %v684_v6 = vadd.f32 %v683_v4, %v3031_v7 }
  0xf3   : > { %v754_v45 = vmul.f32 0.01, %v635_v53  ;;  %vm722_vm10 = vcmp.gt.f32.partialorder %v635_v53, 0.0  ;;  %v800_v26 = vsel %vm736_vm12, %v653_v0, %v768_v17 }
  0xf4   : > { %v755_v9 = vmul.f32 0.01, %v684_v6  ;;  %vm723_vm11 = vcmp.gt.f32.partialorder %v684_v6, 0.0  ;;  %v769_v21 = vmul.f32 0.01, %v702_v16  ;;  %vm737_vm14 = vcmp.gt.f32.partialorder %v702_v16, 0.0 }
  0xf5   : > { %v786_v11 = vsel %vm722_vm10, %v635_v53, %v754_v45 }
  0xf6   : > { %v654_v12 = vpop.f32.mrf.mxu2  ;;  %v3061_v13 = vpack.c.bf16 %v786_v11, %v784_v8  ;;  %v787_v14 = vsel %vm723_vm11, %v684_v6, %v755_v9  ;;  %v801_v30 = vsel %vm737_vm14, %v702_v16, %v769_v21  ;;  %v2493_v21 = vld [vmem:[#allocation10 + $0x78] sm:$0xff] }
  0xf7   : > { %v655_v18 = vadd.f32 %v654_v12, %v3029_v5  ;;  %v3064_v20 = vpack.c.bf16 %v787_v14, %v785_v10  ;;  %1741 = vmatpush.bf16.msra.mxu1 %v2493_v21  ;;  %v2488_v21 = vld [vmem:[#allocation10 + $0x50] sm:$0xff] }
  0xf8   : > { %v637_v15 = vpop.f32.mrf.mxu0  ;;  %1227 = vmatmul.bf16.gmra.mxu0 %v3061_v13 }
  0xf9   : > { %v703_v19 = vpop.f32.mrf.mxu3  ;;  %v770_v54 = vmul.f32 0.01, %v655_v18  ;;  %v686_v23 = vpop.f32.mrf.mxu1  ;;  %1276 = vmatmul.bf16.gmra.mxu1 %v3064_v20  ;;  %vm738_vm13 = vcmp.gt.f32.partialorder %v655_v18, 0.0  ;;  %v638_v25 = vadd.f32 %v637_v15, %v3029_v5 }
  0xfa   : > { %v704_v22 = vadd.f32 %v703_v19, %v3031_v7  ;;  %v687_v28 = vadd.f32 %v686_v23, %v3031_v7  ;;  %v2485_v19 = vld [vmem:[#allocation10 + $0x38] sm:$0xff] }
  0xfb   : > { %962 = vmatmul.bf16.gmra.mxu2 %v3002_v38  ;;  %v802_v27 = vsel %vm738_vm13, %v655_v18, %v770_v54  ;;  %v756_v35 = vmul.f32 0.01, %v638_v25  ;;  %vm724_vm0 = vcmp.gt.f32.partialorder %v638_v25, 0.0  ;;  %1692 = vmatpush.bf16.msra.mxu0 %v2485_v19 }
  0xfc   : > { %v771_v24 = vmul.f32 0.01, %v704_v22  ;;  %vm739_vm15 = vcmp.gt.f32.partialorder %v704_v22, 0.0  ;;  %v3073_v29 = vpack.c.bf16 %v802_v27, %v800_v26  ;;  %v757_v41 = vmul.f32 0.01, %v687_v28 }
  0xfd   : > { %vm725_vm1 = vcmp.gt.f32.partialorder %v687_v28, 0.0  ;;  %v788_v49 = vsel %vm724_vm0, %v638_v25, %v756_v35 }
  0xfe   : > { %1011 = vmatmul.bf16.gmra.mxu3 %v3002_v38  ;;  %v803_v32 = vsel %vm739_vm15, %v704_v22, %v771_v24  ;;  %v657_v34 = vpop.f32.mrf.mxu2  ;;  %v789_v51 = vsel %vm725_vm1, %v687_v28, %v757_v41 }
  0xff   : > { %v3075_v33 = vpack.c.bf16 %v803_v32, %v801_v30  ;;  %v658_v39 = vadd.f32 %v657_v34, %v3029_v5 }
 0x100   : > { %v639_v43 = vpop.f32.mrf.mxu0 }
 0x101   : > { %v706_v40 = vpop.f32.mrf.mxu3  ;;  %v640_v44 = vadd.f32 %v639_v43, %v3029_v5  ;;  %v688_v47 = vpop.f32.mrf.mxu1  ;;  %v772_v58 = vmul.f32 0.01, %v658_v39  ;;  %vm740_vm4 = vcmp.gt.f32.partialorder %v658_v39, 0.0 }
 0x102   : > { %v707_v42 = vadd.f32 %v706_v40, %v3031_v7  ;;  %v689_v38 = vadd.f32 %v688_v47, %v3031_v7 }
 0x103   : > { %v758_v48 = vmul.f32 0.01, %v640_v44  ;;  %vm726_vm2 = vcmp.gt.f32.partialorder %v640_v44, 0.0  ;;  %v804_v4 = vsel %vm740_vm4, %v658_v39, %v772_v58  ;;  %v2492_v58 = vld [vmem:[#allocation10 + $0x70] sm:$0xff] }
 0x104   : > { %v759_v50 = vmul.f32 0.01, %v689_v38  ;;  %vm727_vm3 = vcmp.gt.f32.partialorder %v689_v38, 0.0  ;;  %v773_v63 = vmul.f32 0.01, %v707_v42  ;;  %vm741_vm6 = vcmp.gt.f32.partialorder %v707_v42, 0.0  ;;  %1742 = vmatpush.bf16.msra.mxu1 %v2492_v58 }
 0x105   : > { %v790_v55 = vsel %vm726_vm2, %v640_v44, %v758_v48 }
 0x106   : > { %v659_v37 = vpop.f32.mrf.mxu2  ;;  %v3081_v56 = vpack.c.bf16 %v790_v55, %v788_v49  ;;  %v791_v57 = vsel %vm727_vm3, %v689_v38, %v759_v50  ;;  %v805_v9 = vsel %vm741_vm6, %v707_v42, %v773_v63  ;;  %v2483_v63 = vld [vmem:[#allocation10 + $0x28] sm:$0xff] }
 0x107   : > { %v660_v60 = vadd.f32 %v659_v37, %v3029_v5  ;;  %v3084_v62 = vpack.c.bf16 %v791_v57, %v789_v51  ;;  %v2484_v57 = vld [vmem:[#allocation10 + $0x30] sm:$0xff] }
 0x108   : > { %v642_v1 = vpop.f32.mrf.mxu0  ;;  %1232 = vmatmul.bf16.gmra.mxu0 %v3081_v56 }
 0x109   : > { %v708_v61 = vpop.f32.mrf.mxu3  ;;  %v774_v2 = vmul.f32 0.01, %v660_v60  ;;  %v691_v16 = vpop.f32.mrf.mxu1  ;;  %1281 = vmatmul.bf16.gmra.mxu1 %v3084_v62  ;;  %vm742_vm5 = vcmp.gt.f32.partialorder %v660_v60, 0.0  ;;  %v643_v53 = vadd.f32 %v642_v1, %v3029_v5  ;;  %1693 = vmatpush.bf16.msra.mxu0 %v2484_v57 }
 0x10a   : > { %v709_v0 = vadd.f32 %v708_v61, %v3031_v7  ;;  %v692_v45 = vadd.f32 %v691_v16, %v3031_v7  ;;  %v2482_v16 = vld [vmem:[#allocation10 + $0x20] sm:$0xff] }
 0x10b   : > { %967 = vmatmul.bf16.gmra.mxu2 %v3012_v46  ;;  %v806_v6 = vsel %vm742_vm5, %v660_v60, %v774_v2  ;;  %v760_v14 = vmul.f32 0.01, %v643_v53  ;;  %vm728_vm8 = vcmp.gt.f32.partialorder %v643_v53, 0.0 }
 0x10c   : > { %v775_v3 = vmul.f32 0.01, %v709_v0  ;;  %vm743_vm7 = vcmp.gt.f32.partialorder %v709_v0, 0.0  ;;  %v3093_v8 = vpack.c.bf16 %v806_v6, %v804_v4  ;;  %v761_v22 = vmul.f32 0.01, %v692_v45  ;;  %v2481_v6 = vld [vmem:[#allocation10 + $0x18] sm:$0xff] }
 0x10d   : > { %vm729_vm9 = vcmp.gt.f32.partialorder %v692_v45, 0.0  ;;  %v792_v26 = vsel %vm728_vm8, %v643_v53, %v760_v14  ;;  %1694 = vmatpush.bf16.msra.mxu0 %v2483_v63 }
 0x10e   : > { %1016 = vmatmul.bf16.gmra.mxu3 %v3012_v46  ;;  %v807_v10 = vsel %vm743_vm7, %v709_v0, %v775_v3  ;;  %v662_v12 = vpop.f32.mrf.mxu2  ;;  %v793_v28 = vsel %vm729_vm9, %v692_v45, %v761_v22  ;;  %v2491_v0 = vld [vmem:[#allocation10 + $0x68] sm:$0xff]  ;;  %v2490_v3 = vld [vmem:[#allocation10 + $0x60] sm:$0xff] }
 0x10f   : > { %v3095_v11 = vpack.c.bf16 %v807_v10, %v805_v9  ;;  %v663_v17 = vadd.f32 %v662_v12, %v3029_v5  ;;  %1743 = vmatpush.bf16.msra.mxu1 %v2491_v0  ;;  %v2479_v9 = vld [vmem:[#allocation10 + $0x8] sm:$0xff]  ;;  %v2478_v10 = vld [vmem:[#allocation10] sm:$0xff] }
 0x110   : > { %v644_v54 = vpop.f32.mrf.mxu0 }
 0x111   : > { %v711_v18 = vpop.f32.mrf.mxu3  ;;  %v645_v46 = vadd.f32 %v644_v54, %v3029_v5  ;;  %v693_v23 = vpop.f32.mrf.mxu1  ;;  %v776_v39 = vmul.f32 0.01, %v663_v17  ;;  %vm744_vm12 = vcmp.gt.f32.partialorder %v663_v17, 0.0  ;;  %1695 = vmatpush.bf16.msra.mxu0 %v2482_v16 }
 0x112   : > { %v712_v15 = vadd.f32 %v711_v18, %v3031_v7  ;;  %v694_v24 = vadd.f32 %v693_v23, %v3031_v7  ;;  %v3162_v23 = vld [vmem:[%s3364_s5] sm:$0x3] }
 0x113   : > { %v762_v25 = vmul.f32 0.01, %v645_v46  ;;  %vm730_vm10 = vcmp.gt.f32.partialorder %v645_v46, 0.0  ;;  %v808_v48 = vsel %vm744_vm12, %v663_v17, %v776_v39  ;;  %1744 = vmatpush.bf16.msra.mxu1 %v2490_v3  ;;  %v2489_v17 = vld [vmem:[#allocation10 + $0x58] sm:$0xff] }
 0x114   : > { %v763_v27 = vmul.f32 0.01, %v694_v24  ;;  %vm731_vm11 = vcmp.gt.f32.partialorder %v694_v24, 0.0  ;;  %v777_v43 = vmul.f32 0.01, %v712_v15  ;;  %vm745_vm14 = vcmp.gt.f32.partialorder %v712_v15, 0.0 }
 0x115   : > { %v794_v30 = vsel %vm730_vm10, %v645_v46, %v762_v25  ;;  %1696 = vmatpush.bf16.msra.mxu0 %v2481_v6 }
 0x116   : > { %v664_v32 = vpop.f32.mrf.mxu2  ;;  %v818_v34 = vpack.c.bf16 %v794_v30, %v792_v26  ;;  %v795_v35 = vsel %vm731_vm11, %v694_v24, %v763_v27  ;;  %v809_v50 = vsel %vm745_vm14, %v712_v15, %v777_v43 }
 0x117   : > { %v665_v40 = vadd.f32 %v664_v32, %v3029_v5  ;;  %v819_v42 = vpack.c.bf16 %v795_v35, %v793_v28  ;;  %1745 = vmatpush.bf16.msra.mxu1 %v2489_v17  ;;  %v2486_v17 = vld [vmem:[#allocation10 + $0x40] sm:$0xff] }
 0x118   : > { %1237 = vmatmul.bf16.gmra.mxu0 %v818_v34 }
 0x119   : > { %v713_v41 = vpop.f32.mrf.mxu3  ;;  %v778_v47 = vmul.f32 0.01, %v665_v40  ;;  %1286 = vmatmul.bf16.gmra.mxu1 %v819_v42  ;;  %vm746_vm13 = vcmp.gt.f32.partialorder %v665_v40, 0.0 }
 0x11a   : > { %v714_v44 = vadd.f32 %v713_v41, %v3031_v7 }
 0x11b   : > { %1320 = vmatmul.bf16.vlgmr.msra.gmra.mxu2 %v3041_v31  ;;  %v810_v49 = vsel %vm746_vm13, %v665_v40, %v778_v47  ;;  %1746 = vmatpush.bf16.msra.mxu1 %v2488_v21 }
 0x11c   : > { %v779_v38 = vmul.f32 0.01, %v714_v44  ;;  %vm747_vm15 = vcmp.gt.f32.partialorder %v714_v44, 0.0  ;;  %v3105_v5 = vpack.c.bf16 %v810_v49, %v808_v48 }
 0x11e   : > { %1369 = vmatmul.bf16.vlgmr.msra.gmra.mxu3 %v3044_v36  ;;  %v811_v51 = vsel %vm747_vm15, %v714_v44, %v779_v38  ;;  %v933_v7 = vpop.f32.mrf.mxu2 }
 0x11f   : > { %v3107_v55 = vpack.c.bf16 %v811_v51, %v809_v50 }
 0x121   : > { %v3109_v37 = vpop.f32.mrf.mxu3 }
 0x126   : > { %v3111_v60 = vpop.f32.mrf.mxu2 }
 0x128   : > { %1242 = vmatmul.bf16.gmra.mxu0 %v3053_v52 }
 0x129   : > { %v3113_v31 = vpop.f32.mrf.mxu3  ;;  %1291 = vmatmul.bf16.gmra.mxu1 %v3055_v59 }
 0x12b   : > { %1325 = vmatmul.bf16.gmra.mxu2 %v3061_v13 }
 0x12e   : > { %1374 = vmatmul.bf16.gmra.mxu3 %v3064_v20  ;;  %v3119_v36 = vpop.f32.mrf.mxu2 }
 0x131   : > { %v3121_v61 = vpop.f32.mrf.mxu3 }
 0x136   : > { %v3123_v1 = vpop.f32.mrf.mxu2 }
 0x138   : > { %1247 = vmatmul.bf16.gmra.mxu0 %v3073_v29 }
 0x139   : > { %v3125_v2 = vpop.f32.mrf.mxu3  ;;  %1296 = vmatmul.bf16.gmra.mxu1 %v3075_v33 }
 0x13b   : > { %1330 = vmatmul.bf16.gmra.mxu2 %v3081_v56  ;;  %v2480_v56 = vld [vmem:[#allocation10 + $0x10] sm:$0xff] }
 0x13c   : > { %1697 = vmatpush.bf16.msra.mxu0 %v2480_v56 }
 0x13e   : > { %1379 = vmatmul.bf16.gmra.mxu3 %v3084_v62  ;;  %v3131_v13 = vpop.f32.mrf.mxu2 }
 0x140   : > { %1698 = vmatpush.bf16.msra.mxu0 %v2479_v9 }
 0x141   : > { %v3133_v20 = vpop.f32.mrf.mxu3 }
 0x144   : > { %1699 = vmatpush.bf16.msra.mxu0 %v2478_v10 }
 0x146   : > { %v3135_v53 = vpop.f32.mrf.mxu2 }
 0x148   : > { %1252 = vmatmul.bf16.gmra.mxu0 %v3093_v8 }
 0x149   : > { %v3137_v4 = vpop.f32.mrf.mxu3  ;;  %1301 = vmatmul.bf16.gmra.mxu1 %v3095_v11 }
 0x14b   : > { %1335 = vmatmul.bf16.gmra.mxu2 %v818_v34 }
 0x14e   : > { %1384 = vmatmul.bf16.gmra.mxu3 %v819_v42  ;;  %v3141_v62 = vpop.f32.mrf.mxu2 }
 0x151   : > { %v3143_v45 = vpop.f32.mrf.mxu3 }
 0x156   : > { %v3145_v12 = vpop.f32.mrf.mxu2 }
 0x158   : > { %1257 = vmatmul.bf16.gmra.mxu0 %v3105_v5 }
 0x159   : > { %v3147_v14 = vpop.f32.mrf.mxu3  ;;  %1306 = vmatmul.bf16.gmra.mxu1 %v3107_v55 }
 0x15b   : > { %1340 = vmatmul.bf16.gmra.mxu2 %v3053_v52 }
 0x15e   : > { %1389 = vmatmul.bf16.gmra.mxu3 %v3055_v59  ;;  %v3153_v18 = vpop.f32.mrf.mxu2  ;;  %v3167_v59 = vperm.slane %v3162_v23, 0 }
 0x161   : > { %v3155_v19 = vpop.f32.mrf.mxu3 }
 0x165   : > { %v1223_v22 = vpop.f32.mrf.mxu0 }
 0x166   : > { %v1224_v15 = vadd.f32 %v1223_v22, %v933_v7  ;;  %v1272_v54 = vpop.f32.mrf.mxu1  ;;  %v3157_v46 = vpop.f32.mrf.mxu2 }
 0x168   : > { %v1273_v52 = vadd.f32 %v1272_v54, %v1224_v15 }
 0x169   : > { %v3164_v24 = vpop.f32.mrf.mxu3 }
 0x16a   : > { %v1416_v26 = vadd.f32 %v3167_v59, %v1273_v52 }
 0x16b   : > { %1345 = vmatmul.bf16.gmra.mxu2 %v3073_v29  ;;  %v2487_v29 = vld [vmem:[#allocation10 + $0x48] sm:$0xff] }
 0x16c   : > { %v1480_v35 = vmul.f32 0.01, %v1416_v26  ;;  %vm1448_vm0 = vcmp.gt.f32.partialorder %v1416_v26, 0.0  ;;  %1747 = vmatpush.bf16.msra.mxu1 %v2487_v29 }
 0x16d   : > { %v1225_v25 = vpop.f32.mrf.mxu0 }
 0x16e   : > { %1394 = vmatmul.bf16.gmra.mxu3 %v3075_v33  ;;  %v1226_v27 = vadd.f32 %v1225_v25, %v3111_v60  ;;  %v1274_v28 = vpop.f32.mrf.mxu1  ;;  %v3173_v30 = vpop.f32.mrf.mxu2  ;;  %v1512_v33 = vsel %vm1448_vm0, %v1416_v26, %v1480_v35 }
 0x170   : > { %v1275_v34 = vadd.f32 %v1274_v28, %v1226_v27  ;;  %1748 = vmatpush.bf16.msra.mxu1 %v2486_v17 }
 0x171   : > { %v3175_v32 = vpop.f32.mrf.mxu3 }
 0x172   : > { %v1418_v39 = vadd.f32 %v3167_v59, %v1275_v34 }
 0x174   : > { %vm1450_vm1 = vcmp.gt.f32.partialorder %v1418_v39, 0.0  ;;  %v1482_v40 = vmul.f32 0.01, %v1418_v39 }
 0x175   : > { %v1228_v41 = vpop.f32.mrf.mxu0 }
 0x176   : > { %v1514_v42 = vsel %vm1450_vm1, %v1418_v39, %v1482_v40  ;;  %v1229_v43 = vadd.f32 %v1228_v41, %v3119_v36  ;;  %v1277_v44 = vpop.f32.mrf.mxu1  ;;  %v3179_v47 = vpop.f32.mrf.mxu2 }
 0x177   : > { %v1544_v38 = vpack.c.bf16 %v1514_v42, %v1512_v33 }
 0x178   : > { %v1278_v49 = vadd.f32 %v1277_v44, %v1229_v43 }
 0x179   : > { %v3181_v48 = vpop.f32.mrf.mxu3  ;;  %1700 = vmatmul.bf16.vlgmr.msra.gmra.mxu0 %v1544_v38 }
 0x17a   : > { %v1420_v51 = vadd.f32 %v3167_v59, %v1278_v49 }
 0x17b   : > { %1350 = vmatmul.bf16.gmra.mxu2 %v3093_v8 }
 0x17c   : > { %v1484_v63 = vmul.f32 0.01, %v1420_v51  ;;  %vm1452_vm2 = vcmp.gt.f32.partialorder %v1420_v51, 0.0 }
 0x17d   : > { %v1230_v50 = vpop.f32.mrf.mxu0 }
 0x17e   : > { %1399 = vmatmul.bf16.gmra.mxu3 %v3095_v11  ;;  %v1231_v7 = vadd.f32 %v1230_v50, %v3123_v1  ;;  %v1279_v57 = vpop.f32.mrf.mxu1  ;;  %v3187_v58 = vpop.f32.mrf.mxu2  ;;  %v1516_v56 = vsel %vm1452_vm2, %v1420_v51, %v1484_v63  ;;  %v3216_v63 = vperm.slane %v3162_v23, 1 }
 0x180   : > { %v1280_v36 = vadd.f32 %v1279_v57, %v1231_v7 }
 0x181   : > { %v3189_v60 = vpop.f32.mrf.mxu3 }
 0x182   : > { %v1422_v0 = vadd.f32 %v3167_v59, %v1280_v36 }
 0x184   : > { %v1486_v16 = vmul.f32 0.01, %v1422_v0  ;;  %vm1454_vm3 = vcmp.gt.f32.partialorder %v1422_v0, 0.0 }
 0x185   : > { %v1233_v8 = vpop.f32.mrf.mxu0 }
 0x186   : > { %v1234_v11 = vadd.f32 %v1233_v8, %v3131_v13  ;;  %v1282_v3 = vpop.f32.mrf.mxu1  ;;  %v3193_v6 = vpop.f32.mrf.mxu2  ;;  %v1518_v1 = vsel %vm1454_vm3, %v1422_v0, %v1486_v16 }
 0x187   : > { %v1546_v10 = vpack.c.bf16 %v1518_v1, %v1516_v56 }
 0x188   : > { %v1283_v21 = vadd.f32 %v1282_v3, %v1234_v11 }
 0x189   : > { %v3195_v9 = vpop.f32.mrf.mxu3  ;;  %1705 = vmatmul.bf16.gmra.mxu0 %v1546_v10 }
 0x18a   : > { %v1424_v15 = vadd.f32 %v3167_v59, %v1283_v21 }
 0x18b   : > { %1355 = vmatmul.bf16.gmra.mxu2 %v3105_v5 }
 0x18c   : > { %v1488_v27 = vmul.f32 0.01, %v1424_v15  ;;  %vm1456_vm4 = vcmp.gt.f32.partialorder %v1424_v15, 0.0 }
 0x18d   : > { %v1235_v22 = vpop.f32.mrf.mxu0 }
 0x18e   : > { %1404 = vmatmul.bf16.gmra.mxu3 %v3107_v55  ;;  %v1236_v13 = vadd.f32 %v1235_v22, %v3135_v53  ;;  %v1284_v54 = vpop.f32.mrf.mxu1  ;;  %v3201_v52 = vpop.f32.mrf.mxu2  ;;  %v1520_v40 = vsel %vm1456_vm4, %v1424_v15, %v1488_v27 }
 0x190   : > { %v1285_v26 = vadd.f32 %v1284_v54, %v1236_v13 }
 0x191   : > { %v3203_v25 = vpop.f32.mrf.mxu3 }
 0x192   : > { %v1426_v28 = vadd.f32 %v3167_v59, %v1285_v26 }
 0x194   : > { %v1490_v34 = vmul.f32 0.01, %v1426_v28  ;;  %vm1458_vm5 = vcmp.gt.f32.partialorder %v1426_v28, 0.0 }
 0x195   : > { %v1238_v5 = vpop.f32.mrf.mxu0 }
 0x196   : > { %v1239_v55 = vadd.f32 %v1238_v5, %v3141_v62  ;;  %v1287_v35 = vpop.f32.mrf.mxu1  ;;  %v3207_v39 = vpop.f32.mrf.mxu2  ;;  %v1522_v53 = vsel %vm1458_vm5, %v1426_v28, %v1490_v34 }
 0x197   : > { %v1548_v41 = vpack.c.bf16 %v1522_v53, %v1520_v40 }
 0x198   : > { %v1288_v33 = vadd.f32 %v1287_v35, %v1239_v55 }
 0x199   : > { %v3209_v29 = vpop.f32.mrf.mxu3  ;;  %1710 = vmatmul.bf16.gmra.mxu0 %v1548_v41 }
 0x19a   : > { %v1428_v43 = vadd.f32 %v3167_v59, %v1288_v33 }
 0x19c   : > { %v1492_v7 = vmul.f32 0.01, %v1428_v43  ;;  %vm1460_vm6 = vcmp.gt.f32.partialorder %v1428_v43, 0.0 }
 0x19d   : > { %v1240_v42 = vpop.f32.mrf.mxu0 }
 0x19e   : > { %v1241_v44 = vadd.f32 %v1240_v42, %v3145_v12  ;;  %v1289_v38 = vpop.f32.mrf.mxu1  ;;  %v1321_v49 = vpop.f32.mrf.mxu2  ;;  %v1524_v3 = vsel %vm1460_vm6, %v1428_v43, %v1492_v7 }
 0x19f   : > { %v1322_v50 = vadd.f32 %v1321_v49, %v3109_v37 }
 0x1a0   : > { %v1290_v51 = vadd.f32 %v1289_v38, %v1241_v44 }
 0x1a1   : > { %v1370_v62 = vpop.f32.mrf.mxu3 }
 0x1a2   : > { %v1430_v57 = vadd.f32 %v3167_v59, %v1290_v51  ;;  %v1371_v36 = vadd.f32 %v1370_v62, %v1322_v50 }
 0x1a4   : > { %v1494_v0 = vmul.f32 0.01, %v1430_v57  ;;  %vm1462_vm7 = vcmp.gt.f32.partialorder %v1430_v57, 0.0  ;;  %v1417_v37 = vadd.f32 %v3216_v63, %v1371_v36 }
 0x1a5   : > { %v1243_v16 = vpop.f32.mrf.mxu0 }
 0x1a6   : > { %v1244_v8 = vadd.f32 %v1243_v16, %v3153_v18  ;;  %v1292_v12 = vpop.f32.mrf.mxu1  ;;  %v1323_v11 = vpop.f32.mrf.mxu2  ;;  %v1526_v56 = vsel %vm1462_vm7, %v1430_v57, %v1494_v0  ;;  %v1481_v23 = vmul.f32 0.01, %v1417_v37  ;;  %vm1449_vm8 = vcmp.gt.f32.partialorder %v1417_v37, 0.0 }
 0x1a7   : > { %v1324_v1 = vadd.f32 %v1323_v11, %v3113_v31  ;;  %v1550_v17 = vpack.c.bf16 %v1526_v56, %v1524_v3 }
 0x1a8   : > { %v1293_v22 = vadd.f32 %v1292_v12, %v1244_v8  ;;  %v1513_v34 = vsel %vm1449_vm8, %v1417_v37, %v1481_v23 }
 0x1a9   : > { %v1372_v10 = vpop.f32.mrf.mxu3  ;;  %1715 = vmatmul.bf16.gmra.mxu0 %v1550_v17 }
 0x1aa   : > { %v1373_v21 = vadd.f32 %v1372_v10, %v1324_v1  ;;  %v1432_v54 = vadd.f32 %v3167_v59, %v1293_v22 }
 0x1ac   : > { %v1419_v15 = vadd.f32 %v3216_v63, %v1373_v21  ;;  %v1496_v53 = vmul.f32 0.01, %v1432_v54  ;;  %vm1464_vm10 = vcmp.gt.f32.partialorder %v1432_v54, 0.0 }
 0x1ad   : > { %v1245_v18 = vpop.f32.mrf.mxu0 }
 0x1ae   : > { %vm1451_vm9 = vcmp.gt.f32.partialorder %v1419_v15, 0.0  ;;  %v1483_v13 = vmul.f32 0.01, %v1419_v15  ;;  %v1246_v26 = vadd.f32 %v1245_v18, %v3157_v46  ;;  %v1294_v27 = vpop.f32.mrf.mxu1  ;;  %v1326_v28 = vpop.f32.mrf.mxu2  ;;  %v1528_v49 = vsel %vm1464_vm10, %v1432_v54, %v1496_v53 }
 0x1af   : > { %v1327_v5 = vadd.f32 %v1326_v28, %v3121_v61 }
 0x1b0   : > { %v1515_v31 = vsel %vm1451_vm9, %v1419_v15, %v1483_v13  ;;  %v1295_v40 = vadd.f32 %v1294_v27, %v1246_v26 }
 0x1b1   : > { %v1375_v55 = vpop.f32.mrf.mxu3  ;;  %v1545_v35 = vpack.c.bf16 %v1515_v31, %v1513_v34 }
 0x1b2   : > { %v1434_v41 = vadd.f32 %v3167_v59, %v1295_v40  ;;  %v1376_v33 = vadd.f32 %v1375_v55, %v1327_v5 }
 0x1b3   : > { %1749 = vmatmul.bf16.vlgmr.msra.gmra.mxu1 %v1545_v35 }
 0x1b4   : > { %vm1466_vm11 = vcmp.gt.f32.partialorder %v1434_v41, 0.0  ;;  %v1498_v42 = vmul.f32 0.01, %v1434_v41  ;;  %v1421_v61 = vadd.f32 %v3216_v63, %v1376_v33 }
 0x1b5   : > { %v1248_v43 = vpop.f32.mrf.mxu0 }
 0x1b6   : > { %v1249_v46 = vadd.f32 %v1248_v43, %v3173_v30  ;;  %v1297_v44 = vpop.f32.mrf.mxu1  ;;  %v1328_v38 = vpop.f32.mrf.mxu2  ;;  %v1530_v50 = vsel %vm1466_vm11, %v1434_v41, %v1498_v42  ;;  %v1485_v0 = vmul.f32 0.01, %v1421_v61  ;;  %vm1453_vm12 = vcmp.gt.f32.partialorder %v1421_v61, 0.0 }
 0x1b7   : > { %v1329_v62 = vadd.f32 %v1328_v38, %v3125_v2  ;;  %v1552_v7 = vpack.c.bf16 %v1530_v50, %v1528_v49 }
 0x1b8   : > { %v1298_v36 = vadd.f32 %v1297_v44, %v1249_v46  ;;  %v1517_v1 = vsel %vm1453_vm12, %v1421_v61, %v1485_v0 }
 0x1b9   : > { %v1377_v51 = vpop.f32.mrf.mxu3  ;;  %1720 = vmatmul.bf16.gmra.mxu0 %v1552_v7 }
 0x1ba   : > { %v1378_v57 = vadd.f32 %v1377_v51, %v1329_v62  ;;  %v1436_v12 = vadd.f32 %v3167_v59, %v1298_v36 }
 0x1bc   : > { %v1423_v16 = vadd.f32 %v3216_v63, %v1378_v57  ;;  %v1500_v22 = vmul.f32 0.01, %v1436_v12  ;;  %vm1468_vm14 = vcmp.gt.f32.partialorder %v1436_v12, 0.0 }
 0x1bd   : > { %v1250_v30 = vpop.f32.mrf.mxu0 }
 0x1be   : > { %vm1455_vm13 = vcmp.gt.f32.partialorder %v1423_v16, 0.0  ;;  %v1487_v8 = vmul.f32 0.01, %v1423_v16  ;;  %v1251_v11 = vadd.f32 %v1250_v30, %v3179_v47  ;;  %v1299_v3 = vpop.f32.mrf.mxu1  ;;  %v1331_v56 = vpop.f32.mrf.mxu2  ;;  %v1532_v27 = vsel %vm1468_vm14, %v1436_v12, %v1500_v22 }
 0x1bf   : > { %v1332_v2 = vadd.f32 %v1331_v56, %v3133_v20 }
 0x1c0   : > { %v1519_v10 = vsel %vm1455_vm13, %v1423_v16, %v1487_v8  ;;  %v1300_v17 = vadd.f32 %v1299_v3, %v1251_v11 }
 0x1c1   : > { %v1380_v37 = vpop.f32.mrf.mxu3  ;;  %v1547_v21 = vpack.c.bf16 %v1519_v10, %v1517_v1 }
 0x1c2   : > { %v1438_v23 = vadd.f32 %v3167_v59, %v1300_v17  ;;  %v1381_v15 = vadd.f32 %v1380_v37, %v1332_v2 }
 0x1c3   : > { %1754 = vmatmul.bf16.gmra.mxu1 %v1547_v21 }
 0x1c4   : > { %vm1470_vm15 = vcmp.gt.f32.partialorder %v1438_v23, 0.0  ;;  %v1502_v13 = vmul.f32 0.01, %v1438_v23  ;;  %v1425_v28 = vadd.f32 %v3216_v63, %v1381_v15 }
 0x1c5   : > { %v1253_v18 = vpop.f32.mrf.mxu0 }
 0x1c6   : > { %v1254_v47 = vadd.f32 %v1253_v18, %v3187_v58  ;;  %v1302_v54 = vpop.f32.mrf.mxu1  ;;  %v1333_v26 = vpop.f32.mrf.mxu2  ;;  %v1534_v20 = vsel %vm1470_vm15, %v1438_v23, %v1502_v13  ;;  %v1489_v40 = vmul.f32 0.01, %v1425_v28  ;;  %vm1457_vm0 = vcmp.gt.f32.partialorder %v1425_v28, 0.0 }
 0x1c7   : > { %v1334_v34 = vadd.f32 %v1333_v26, %v3137_v4  ;;  %v1554_v5 = vpack.c.bf16 %v1534_v20, %v1532_v27 }
 0x1c8   : > { %v1303_v35 = vadd.f32 %v1302_v54, %v1254_v47  ;;  %v1521_v38 = vsel %vm1457_vm0, %v1425_v28, %v1489_v40 }
 0x1c9   : > { %v1382_v31 = vpop.f32.mrf.mxu3  ;;  %1725 = vmatmul.bf16.gmra.mxu0 %v1554_v5 }
 0x1ca   : > { %v1383_v55 = vadd.f32 %v1382_v31, %v1334_v34  ;;  %v1440_v33 = vadd.f32 %v3167_v59, %v1303_v35 }
 0x1cc   : > { %v1427_v53 = vadd.f32 %v3216_v63, %v1383_v55  ;;  %v1504_v62 = vmul.f32 0.01, %v1440_v33  ;;  %vm1472_vm2 = vcmp.gt.f32.partialorder %v1440_v33, 0.0 }
 0x1cd   : > { %v1255_v58 = vpop.f32.mrf.mxu0 }
 0x1ce   : > { %vm1459_vm1 = vcmp.gt.f32.partialorder %v1427_v53, 0.0  ;;  %v1491_v41 = vmul.f32 0.01, %v1427_v53  ;;  %v1256_v42 = vadd.f32 %v1255_v58, %v3193_v6  ;;  %v1304_v43 = vpop.f32.mrf.mxu1  ;;  %v1336_v46 = vpop.f32.mrf.mxu2  ;;  %v1536_v8 = vsel %vm1472_vm2, %v1440_v33, %v1504_v62 }
 0x1cf   : > { %v1337_v4 = vadd.f32 %v1336_v46, %v3143_v45 }
 0x1d0   : > { %v1523_v49 = vsel %vm1459_vm1, %v1427_v53, %v1491_v41  ;;  %v1305_v50 = vadd.f32 %v1304_v43, %v1256_v42 }
 0x1d1   : > { %v1385_v44 = vpop.f32.mrf.mxu3  ;;  %v1549_v61 = vpack.c.bf16 %v1523_v49, %v1521_v38 }
 0x1d2   : > { %v1442_v51 = vadd.f32 %v3167_v59, %v1305_v50  ;;  %v1386_v7 = vadd.f32 %v1385_v44, %v1337_v4 }
 0x1d3   : > { %1759 = vmatmul.bf16.gmra.mxu1 %v1549_v61 }
 0x1d4   : > { %vm1474_vm3 = vcmp.gt.f32.partialorder %v1442_v51, 0.0  ;;  %v1506_v57 = vmul.f32 0.01, %v1442_v51  ;;  %v1429_v30 = vadd.f32 %v3216_v63, %v1386_v7 }
 0x1d5   : > { %v1258_v36 = vpop.f32.mrf.mxu0 }
 0x1d6   : > { %v1259_v6 = vadd.f32 %v1258_v36, %v3201_v52  ;;  %v1307_v0 = vpop.f32.mrf.mxu1  ;;  %v1338_v16 = vpop.f32.mrf.mxu2  ;;  %v1538_v45 = vsel %vm1474_vm3, %v1442_v51, %v1506_v57  ;;  %v1493_v37 = vmul.f32 0.01, %v1429_v30  ;;  %vm1461_vm4 = vcmp.gt.f32.partialorder %v1429_v30, 0.0 }
 0x1d7   : > { %v1339_v12 = vadd.f32 %v1338_v16, %v3147_v14  ;;  %v1556_v3 = vpack.c.bf16 %v1538_v45, %v1536_v8 }
 0x1d8   : > { %v1308_v2 = vadd.f32 %v1307_v0, %v1259_v6  ;;  %v1525_v13 = vsel %vm1461_vm4, %v1429_v30, %v1493_v37 }
 0x1d9   : > { %v1387_v11 = vpop.f32.mrf.mxu3  ;;  %1730 = vmatmul.bf16.gmra.mxu0 %v1556_v3 }
 0x1da   : > { %v1388_v56 = vadd.f32 %v1387_v11, %v1339_v12  ;;  %v1444_v17 = vadd.f32 %v3167_v59, %v1308_v2 }
 0x1dc   : > { %v1431_v1 = vadd.f32 %v3216_v63, %v1388_v56  ;;  %v1508_v26 = vmul.f32 0.01, %v1444_v17  ;;  %vm1476_vm6 = vcmp.gt.f32.partialorder %v1444_v17, 0.0 }
 0x1dd   : > { %v1260_v52 = vpop.f32.mrf.mxu0 }
 0x1de   : > { %vm1463_vm5 = vcmp.gt.f32.partialorder %v1431_v1, 0.0  ;;  %v1495_v10 = vmul.f32 0.01, %v1431_v1  ;;  %v1261_v21 = vadd.f32 %v1260_v52, %v3207_v39  ;;  %v1341_v22 = vpop.f32.mrf.mxu2  ;;  %v1309_v23 = vpop.f32.mrf.mxu1  ;;  %v1540_v31 = vsel %vm1476_vm6, %v1444_v17, %v1508_v26 }
 0x1df   : > { %v1342_v14 = vadd.f32 %v1341_v22, %v3155_v19 }
 0x1e0   : > { %v1527_v18 = vsel %vm1463_vm5, %v1431_v1, %v1495_v10  ;;  %v1310_v47 = vadd.f32 %v1309_v23, %v1261_v21 }
 0x1e1   : > { %v1390_v15 = vpop.f32.mrf.mxu3  ;;  %v1551_v54 = vpack.c.bf16 %v1527_v18, %v1525_v13 }
 0x1e2   : > { %v1446_v27 = vadd.f32 %v3167_v59, %v1310_v47  ;;  %v1391_v20 = vadd.f32 %v1390_v15, %v1342_v14 }
 0x1e3   : > { %1764 = vmatmul.bf16.gmra.mxu1 %v1551_v54 }
 0x1e4   : > { %vm1478_vm7 = vcmp.gt.f32.partialorder %v1446_v27, 0.0  ;;  %v1510_v28 = vmul.f32 0.01, %v1446_v27  ;;  %v1433_v5 = vadd.f32 %v3216_v63, %v1391_v20 }
 0x1e6   : > { %v1343_v34 = vpop.f32.mrf.mxu2  ;;  %v1542_v39 = vsel %vm1478_vm7, %v1446_v27, %v1510_v28  ;;  %v1497_v53 = vmul.f32 0.01, %v1433_v5  ;;  %vm1465_vm8 = vcmp.gt.f32.partialorder %v1433_v5, 0.0 }
 0x1e7   : > { %v1344_v19 = vadd.f32 %v1343_v34, %v3164_v24  ;;  %v1558_v35 = vpack.c.bf16 %v1542_v39, %v1540_v31  ;;  %v3268_v34 = vld [vmem:[%s3366_s7] ss:$0 sm:$0xff] }
 0x1e8   : > { %v1529_v43 = vsel %vm1465_vm8, %v1433_v5, %v1497_v53 }
 0x1e9   : > { %v1392_v55 = vpop.f32.mrf.mxu3  ;;  %1735 = vmatmul.bf16.gmra.mxu0 %v1558_v35 }
 0x1ea   : > { %v1393_v40 = vadd.f32 %v1392_v55, %v1344_v19 }
 0x1ec   : > { %v1435_v41 = vadd.f32 %v3216_v63, %v1393_v40 }
 0x1ee   : > { %vm1467_vm9 = vcmp.gt.f32.partialorder %v1435_v41, 0.0  ;;  %v1499_v59 = vmul.f32 0.01, %v1435_v41  ;;  %v1346_v58 = vpop.f32.mrf.mxu2 }
 0x1ef   : > { %v1347_v33 = vadd.f32 %v1346_v58, %v3175_v32 }
 0x1f0   : > { %v1531_v46 = vsel %vm1467_vm9, %v1435_v41, %v1499_v59 }
 0x1f1   : > { %v1395_v42 = vpop.f32.mrf.mxu3  ;;  %v1553_v4 = vpack.c.bf16 %v1531_v46, %v1529_v43 }
 0x1f2   : > { %v1396_v44 = vadd.f32 %v1395_v42, %v1347_v33 }
 0x1f3   : > { %1769 = vmatmul.bf16.gmra.mxu1 %v1553_v4 }
 0x1f4   : > { %v1437_v38 = vadd.f32 %v3216_v63, %v1396_v44 }
 0x1f6   : > { %v1348_v24 = vpop.f32.mrf.mxu2  ;;  %v1501_v62 = vmul.f32 0.01, %v1437_v38  ;;  %vm1469_vm10 = vcmp.gt.f32.partialorder %v1437_v38, 0.0  ;;  %v1701_v2 = vpop.f32.mrf.mxu0 }
 0x1f7   : > { %v1349_v49 = vadd.f32 %v1348_v24, %v3181_v48 }
 0x1f8   : > { %v1533_v6 = vsel %vm1469_vm10, %v1437_v38, %v1501_v62 }
 0x1f9   : > { %v1397_v50 = vpop.f32.mrf.mxu3 }
 0x1fa   : > { %v1398_v61 = vadd.f32 %v1397_v50, %v1349_v49 }
 0x1fc   : > { %v1439_v51 = vadd.f32 %v3216_v63, %v1398_v61 }
 0x1fe   : > { %vm1471_vm11 = vcmp.gt.f32.partialorder %v1439_v51, 0.0  ;;  %v1503_v7 = vmul.f32 0.01, %v1439_v51  ;;  %v1351_v32 = vpop.f32.mrf.mxu2 }
 0x1ff   : > { %v1352_v57 = vadd.f32 %v1351_v32, %v3189_v60 }
 0x200   : > { %v1535_v0 = vsel %vm1471_vm11, %v1439_v51, %v1503_v7 }
 0x201   : > { %v1400_v36 = vpop.f32.mrf.mxu3  ;;  %v1555_v16 = vpack.c.bf16 %v1535_v0, %v1533_v6 }
 0x202   : > { %v1401_v8 = vadd.f32 %v1400_v36, %v1352_v57 }
 0x203   : > { %1774 = vmatmul.bf16.gmra.mxu1 %v1555_v16 }
 0x204   : > { %v1441_v48 = vadd.f32 %v3216_v63, %v1401_v8 }
 0x206   : > { %v1353_v45 = vpop.f32.mrf.mxu2  ;;  %v1505_v3 = vmul.f32 0.01, %v1441_v48  ;;  %vm1473_vm12 = vcmp.gt.f32.partialorder %v1441_v48, 0.0 }
 0x207   : > { %v1354_v30 = vadd.f32 %v1353_v45, %v3195_v9  ;;  %v1703_v9 = vpop.f32.mrf.mxu0 }
 0x208   : > { %v1537_v52 = vsel %vm1473_vm12, %v1441_v48, %v1505_v3  ;;  %v1704_v53 = vadd.f32 %v3268_v34, %v1703_v9 }
 0x209   : > { %v1402_v12 = vpop.f32.mrf.mxu3 }
 0x20a   : > { %v1403_v11 = vadd.f32 %v1402_v12, %v1354_v30 }
 0x20c   : > { %v1443_v56 = vadd.f32 %v3216_v63, %v1403_v11 }
 0x20e   : > { %vm1475_vm13 = vcmp.gt.f32.partialorder %v1443_v56, 0.0  ;;  %v1507_v60 = vmul.f32 0.01, %v1443_v56  ;;  %v1356_v37 = vpop.f32.mrf.mxu2 }
 0x20f   : > { %v1357_v1 = vadd.f32 %v1356_v37, %v3203_v25  ;;  %v1706_v28 = vpop.f32.mrf.mxu0 }
 0x210   : > { %v1539_v17 = vsel %vm1475_vm13, %v1443_v56, %v1507_v60  ;;  %v1707_v43 = vadd.f32 %v3268_v34, %v1706_v28 }
 0x211   : > { %v1405_v10 = vpop.f32.mrf.mxu3  ;;  %v1557_v21 = vpack.c.bf16 %v1539_v17, %v1537_v52 }
 0x212   : > { %v1406_v22 = vadd.f32 %v1405_v10, %v1357_v1 }
 0x213   : > { %1779 = vmatmul.bf16.gmra.mxu1 %v1557_v21 }
 0x214   : > { %v1445_v14 = vadd.f32 %v3216_v63, %v1406_v22 }
 0x216   : > { %v1358_v23 = vpop.f32.mrf.mxu2  ;;  %v1509_v47 = vmul.f32 0.01, %v1445_v14  ;;  %vm1477_vm14 = vcmp.gt.f32.partialorder %v1445_v14, 0.0 }
 0x217   : > { %v1359_v15 = vadd.f32 %v1358_v23, %v3209_v29  ;;  %v1708_v31 = vpop.f32.mrf.mxu0  ;;  %v1702_v29 = vadd.f32 %v3268_v34, %v1701_v2 }
 0x218   : > { %v1541_v26 = vsel %vm1477_vm14, %v1445_v14, %v1509_v47  ;;  %v1709_v50 = vadd.f32 %v3268_v34, %v1708_v31 }
 0x219   : > { %v1407_v13 = vpop.f32.mrf.mxu3 }
 0x21a   : > { %v1408_v18 = vadd.f32 %v1407_v13, %v1359_v15 }
 0x21c   : > { %v1447_v54 = vadd.f32 %v3216_v63, %v1408_v18  ;;  %v3274_v63 = vld [vmem:[%s3367_s8] ss:$0 sm:$0xff] }
 0x21e   : > { %vm1479_vm15 = vcmp.gt.f32.partialorder %v1447_v54, 0.0  ;;  %v1511_v25 = vmul.f32 0.01, %v1447_v54 }
 0x21f   : > { %v1711_v35 = vpop.f32.mrf.mxu0 }
 0x220   : > { %v1543_v27 = vsel %vm1479_vm15, %v1447_v54, %v1511_v25  ;;  %v1712_v36 = vadd.f32 %v3268_v34, %v1711_v35  ;;  %vm1910_vm15 = vcmask 7168  }
 0x221   : > { %v1559_v20 = vpack.c.bf16 %v1543_v27, %v1541_v26 }
 0x223   : > { %1784 = vmatmul.bf16.gmra.mxu1 %v1559_v20 }
 0x227   : > { %v1713_v46 = vpop.f32.mrf.mxu0 }
 0x228   : > { %v1714_v30 = vadd.f32 %v3268_v34, %v1713_v46 }
 0x22f   : > { %v1716_v51 = vpop.f32.mrf.mxu0 }
 0x230   : > { %v1750_v39 = vpop.f32.mrf.mxu1  ;;  %v1717_v37 = vadd.f32 %v3268_v34, %v1716_v51 }
 0x231   : > { %v1751_v5 = vadd.f32 %v1750_v39, %v1702_v29 }
 0x233   : > { %v1806_v19 = vmul.f32 0.01, %v1751_v5  ;;  %vm1790_vm0 = vcmp.gt.f32.partialorder %v1751_v5, 0.0 }
 0x235   : > { %v1822_v55 = vsel %vm1790_vm0, %v1751_v5, %v1806_v19 }
 0x236   : > { %v1842_v40 = vmul.f32 %v3274_v63, %v1822_v55 }
 0x237   : > { %v1718_v8 = vpop.f32.mrf.mxu0 }
 0x238   : > { %v1752_v41 = vpop.f32.mrf.mxu1  ;;  %1858 = vadd.xlane.f32.xlu0 %v1842_v40  ;;  %v1719_v22 = vadd.f32 %v3268_v34, %v1718_v8 }
 0x239   : > { %v1753_v59 = vadd.f32 %v1752_v41, %v1704_v53 }
 0x23b   : > { %v1807_v58 = vmul.f32 0.01, %v1753_v59  ;;  %vm1791_vm1 = vcmp.gt.f32.partialorder %v1753_v59, 0.0 }
 0x23d   : > { %v1823_v33 = vsel %vm1791_vm1, %v1753_v59, %v1807_v58 }
 0x23e   : > { %v1843_v42 = vmul.f32 %v3274_v63, %v1823_v33 }
 0x23f   : > { %v1721_v2 = vpop.f32.mrf.mxu0 }
 0x240   : > { %v1755_v4 = vpop.f32.mrf.mxu1  ;;  %1860 = vadd.xlane.f32.xlu0 %v1843_v42  ;;  %v1722_v47 = vadd.f32 %v3268_v34, %v1721_v2 }
 0x241   : > { %v1756_v44 = vadd.f32 %v1755_v4, %v1707_v43 }
 0x243   : > { %v1808_v24 = vmul.f32 0.01, %v1756_v44  ;;  %vm1792_vm2 = vcmp.gt.f32.partialorder %v1756_v44, 0.0 }
 0x245   : > { %v1824_v38 = vsel %vm1792_vm2, %v1756_v44, %v1808_v24 }
 0x246   : > { %v1844_v49 = vmul.f32 %v3274_v63, %v1824_v38 }
 0x247   : > { %v1723_v23 = vpop.f32.mrf.mxu0 }
 0x248   : > { %v1757_v61 = vpop.f32.mrf.mxu1  ;;  %1862 = vadd.xlane.f32.xlu1 %v1844_v49  ;;  %v1724_v31 = vadd.f32 %v3268_v34, %v1723_v23 }
 0x249   : > { %v1758_v62 = vadd.f32 %v1757_v61, %v1709_v50 }
 0x24b   : > { %v1809_v7 = vmul.f32 0.01, %v1758_v62  ;;  %vm1793_vm3 = vcmp.gt.f32.partialorder %v1758_v62, 0.0 }
 0x24d   : > { %v1825_v32 = vsel %vm1793_vm3, %v1758_v62, %v1809_v7 }
 0x24e   : > { %v1845_v57 = vmul.f32 %v3274_v63, %v1825_v32 }
 0x24f   : > { %v1726_v26 = vpop.f32.mrf.mxu0 }
 0x250   : > { %v1760_v6 = vpop.f32.mrf.mxu1  ;;  %1864 = vadd.xlane.f32.xlu1 %v1845_v57  ;;  %v1727_v40 = vadd.f32 %v3268_v34, %v1726_v26 }
 0x251   : > { %v1761_v0 = vadd.f32 %v1760_v6, %v1712_v36 }
 0x253   : > { %v1810_v16 = vmul.f32 0.01, %v1761_v0  ;;  %vm1794_vm4 = vcmp.gt.f32.partialorder %v1761_v0, 0.0 }
 0x255   : > { %v1826_v45 = vsel %vm1794_vm4, %v1761_v0, %v1810_v16 }
 0x256   : > { %v1846_v48 = vmul.f32 %v3274_v63, %v1826_v45 }
 0x257   : > { %v1728_v19 = vpop.f32.mrf.mxu0 }
 0x258   : > { %v1762_v12 = vpop.f32.mrf.mxu1  ;;  %1866 = vadd.xlane.f32.xlu2 %v1846_v48  ;;  %v1729_v43 = vadd.f32 %v3268_v34, %v1728_v19 }
 0x259   : > { %v1763_v11 = vadd.f32 %v1762_v12, %v1714_v30 }
 0x25b   : > { %v1811_v3 = vmul.f32 0.01, %v1763_v11  ;;  %vm1795_vm5 = vcmp.gt.f32.partialorder %v1763_v11, 0.0 }
 0x25d   : > { %v1827_v56 = vsel %vm1795_vm5, %v1763_v11, %v1811_v3 }
 0x25e   : > { %v1847_v60 = vmul.f32 %v3274_v63, %v1827_v56 }
 0x25f   : > { %v1731_v33 = vpop.f32.mrf.mxu0 }
 0x260   : > { %v1765_v1 = vpop.f32.mrf.mxu1  ;;  %1868 = vadd.xlane.f32.xlu2 %v1847_v60  ;;  %v1732_v49 = vadd.f32 %v3268_v34, %v1731_v33 }
 0x261   : > { %v1766_v10 = vadd.f32 %v1765_v1, %v1717_v37  ;;  %v2596_v1 = vld [vmem:[#allocation2] ss:$0 sm:$0xff] }
 0x263   : > { %v1812_v52 = vmul.f32 0.01, %v1766_v10  ;;  %vm1796_vm6 = vcmp.gt.f32.partialorder %v1766_v10, 0.0 }
 0x265   : > { %v1828_v17 = vsel %vm1796_vm6, %v1766_v10, %v1812_v52 }
 0x266   : > { %v1848_v21 = vmul.f32 %v3274_v63, %v1828_v17 }
 0x267   : > { %v1733_v50 = vpop.f32.mrf.mxu0 }
 0x268   : > { %v1767_v9 = vpop.f32.mrf.mxu1  ;;  %1870 = vadd.xlane.f32.xlu0 %v1848_v21  ;;  %v1734_v57 = vadd.f32 %v3268_v34, %v1733_v50 }
 0x269   : > { %v1768_v14 = vadd.f32 %v1767_v9, %v1719_v22 }
 0x26b   : > { %v1813_v15 = vmul.f32 0.01, %v1768_v14  ;;  %vm1797_vm7 = vcmp.gt.f32.partialorder %v1768_v14, 0.0 }
 0x26d   : > { %v1829_v13 = vsel %vm1797_vm7, %v1768_v14, %v1813_v15 }
 0x26e   : > { %v1849_v18 = vmul.f32 %v3274_v63, %v1829_v13 }
 0x26f   : > { %v1736_v0 = vpop.f32.mrf.mxu0 }
 0x270   : > { %v1770_v54 = vpop.f32.mrf.mxu1  ;;  %1872 = vadd.xlane.f32.xlu1 %v1849_v18  ;;  %v1737_v48 = vadd.f32 %v3268_v34, %v1736_v0 }
 0x271   : > { %v1771_v25 = vadd.f32 %v1770_v54, %v1722_v47 }
 0x273   : > { %v1814_v27 = vmul.f32 0.01, %v1771_v25  ;;  %vm1798_vm8 = vcmp.gt.f32.partialorder %v1771_v25, 0.0 }
 0x275   : > { %v1830_v20 = vsel %vm1798_vm8, %v1771_v25, %v1814_v27 }
 0x276   : > { %v1850_v28 = vmul.f32 %v3274_v63, %v1830_v20 }
 0x277   : > { %v1738_v3 = vpop.f32.mrf.mxu0 }
 0x278   : > { %v1772_v29 = vpop.f32.mrf.mxu1  ;;  %1874 = vadd.xlane.f32.xlu2 %v1850_v28  ;;  %v1739_v60 = vadd.f32 %v3268_v34, %v1738_v3 }
 0x279   : > { %v1773_v39 = vadd.f32 %v1772_v29, %v1724_v31 }
 0x27b   : > { %v1815_v5 = vmul.f32 0.01, %v1773_v39  ;;  %vm1799_vm9 = vcmp.gt.f32.partialorder %v1773_v39, 0.0 }
 0x27d   : > { %v1831_v55 = vsel %vm1799_vm9, %v1773_v39, %v1815_v5 }
 0x27e   : > { %v1851_v35 = vmul.f32 %v3274_v63, %v1831_v55 }
 0x280   : > { %v1775_v53 = vpop.f32.mrf.mxu1  ;;  %1876 = vadd.xlane.f32.xlu0 %v1851_v35 }
 0x281   : > { %v1776_v41 = vadd.f32 %v1775_v53, %v1727_v40 }
 0x283   : > { %v1816_v59 = vmul.f32 0.01, %v1776_v41  ;;  %vm1800_vm10 = vcmp.gt.f32.partialorder %v1776_v41, 0.0 }
 0x285   : > { %v1832_v58 = vsel %vm1800_vm10, %v1776_v41, %v1816_v59 }
 0x286   : > { %v1852_v42 = vmul.f32 %v3274_v63, %v1832_v58 }
 0x288   : > { %v1777_v46 = vpop.f32.mrf.mxu1  ;;  %1878 = vadd.xlane.f32.xlu1 %v1852_v42 }
 0x289   : > { %v1778_v4 = vadd.f32 %v1777_v46, %v1729_v43 }
 0x28b   : > { %v1817_v44 = vmul.f32 0.01, %v1778_v4  ;;  %vm1801_vm11 = vcmp.gt.f32.partialorder %v1778_v4, 0.0 }
 0x28d   : > { %v1833_v24 = vsel %vm1801_vm11, %v1778_v4, %v1817_v44 }
 0x28e   : > { %v1853_v38 = vmul.f32 %v3274_v63, %v1833_v24 }
 0x290   : > { %v1780_v61 = vpop.f32.mrf.mxu1  ;;  %1880 = vadd.xlane.f32.xlu2 %v1853_v38 }
 0x291   : > { %v1781_v62 = vadd.f32 %v1780_v61, %v1732_v49 }
 0x293   : > { %v1818_v51 = vmul.f32 0.01, %v1781_v62  ;;  %vm1802_vm12 = vcmp.gt.f32.partialorder %v1781_v62, 0.0 }
 0x295   : > { %v1834_v7 = vsel %vm1802_vm12, %v1781_v62, %v1818_v51 }
 0x296   : > { %v1854_v32 = vmul.f32 %v3274_v63, %v1834_v7 }
 0x298   : > { %v1782_v36 = vpop.f32.mrf.mxu1  ;;  %1882 = vadd.xlane.f32.xlu0 %v1854_v32 }
 0x299   : > { %v1783_v6 = vadd.f32 %v1782_v36, %v1734_v57 }
 0x29b   : > { %v1819_v16 = vmul.f32 0.01, %v1783_v6  ;;  %vm1803_vm13 = vcmp.gt.f32.partialorder %v1783_v6, 0.0 }
 0x29d   : > { %v1835_v8 = vsel %vm1803_vm13, %v1783_v6, %v1819_v16 }
 0x29e   : > { %v1855_v45 = vmul.f32 %v3274_v63, %v1835_v8 }
 0x2a0   : > { %v1785_v30 = vpop.f32.mrf.mxu1  ;;  %1884 = vadd.xlane.f32.xlu1 %v1855_v45 }
 0x2a1   : > { %v1786_v12 = vadd.f32 %v1785_v30, %v1737_v48 }
 0x2a3   : > { %v1820_v11 = vmul.f32 0.01, %v1786_v12  ;;  %vm1804_vm14 = vcmp.gt.f32.partialorder %v1786_v12, 0.0 }
 0x2a5   : > { %v1836_v56 = vsel %vm1804_vm14, %v1786_v12, %v1820_v11 }
 0x2a6   : > { %v1856_v2 = vmul.f32 %v3274_v63, %v1836_v56 }
 0x2a8   : > { %v1787_v37 = vpop.f32.mrf.mxu1  ;;  %1886 = vadd.xlane.f32.xlu2 %v1856_v2 }
 0x2a9   : > { %v1788_v10 = vadd.f32 %v1787_v37, %v1739_v60 }
 0x2ab   : > { %v1821_v52 = vmul.f32 0.01, %v1788_v10  ;;  %v1859_v17 = vpop.xlane.xlu0 %1858  ;;  %vm1805_vm0 = vcmp.gt.f32.partialorder %v1788_v10, 0.0 }
 0x2ac   : > { %v1894_v21 = vadd.f32 %v2596_v1, %v1859_v17 }
 0x2ad   : > { %v1837_v34 = vsel %vm1805_vm0, %v1788_v10, %v1821_v52 }
 0x2ae   : > { %1911 = vst.msk [vmem:[%s3311_s12] sm:$0xff] %vm1910_vm15, %v1894_v21  ;;  %v1857_v22 = vmul.f32 %v3274_v63, %v1837_v34 }
 0x2b0   : > { %1888 = vadd.xlane.f32.xlu0 %v1857_v22 }
 0x2b3   : > { %v1861_v23 = vpop.xlane.xlu0 %1860 }
 0x2b4   : > { %v1895_v9 = vadd.f32 %v2596_v1, %v1861_v23 }
 0x2b6   : > { %1912 = vst.msk [vmem:[%s3311_s12 + $0x8] sm:$0xff] %vm1910_vm15, %v1895_v9 }
 0x2bb   : > { %v1863_v14 = vpop.xlane.xlu1 %1862 }
 0x2bc   : > { %v1896_v15 = vadd.f32 %v2596_v1, %v1863_v14 }
 0x2be   : > { %1913 = vst.msk [vmem:[%s3311_s12 + $0x10] sm:$0xff] %vm1910_vm15, %v1896_v15 }
 0x2c3   : > { %v1865_v13 = vpop.xlane.xlu1 %1864 }
 0x2c4   : > { %v1897_v18 = vadd.f32 %v2596_v1, %v1865_v13 }
 0x2c6   : > { %1914 = vst.msk [vmem:[%s3311_s12 + $0x18] sm:$0xff] %vm1910_vm15, %v1897_v18 }
 0x2cb   : > { %v1867_v47 = vpop.xlane.xlu2 %1866 }
 0x2cc   : > { %v1898_v54 = vadd.f32 %v2596_v1, %v1867_v47 }
 0x2ce   : > { %1915 = vst.msk [vmem:[%s3311_s12 + $0x20] sm:$0xff] %vm1910_vm15, %v1898_v54 }
 0x2d3   : > { %v1869_v63 = vpop.xlane.xlu2 %1868 }
 0x2d4   : > { %v1899_v25 = vadd.f32 %v2596_v1, %v1869_v63 }
 0x2d6   : > { %1916 = vst.msk [vmem:[%s3311_s12 + $0x28] sm:$0xff] %vm1910_vm15, %v1899_v25 }
 0x2db   : > { %v1871_v26 = vpop.xlane.xlu0 %1870 }
 0x2dc   : > { %v1900_v27 = vadd.f32 %v2596_v1, %v1871_v26 }
 0x2de   : > { %1917 = vst.msk [vmem:[%s3311_s12 + $0x30] sm:$0xff] %vm1910_vm15, %v1900_v27 }
 0x2e3   : > { %v1873_v20 = vpop.xlane.xlu1 %1872 }
 0x2e4   : > { %v1901_v28 = vadd.f32 %v2596_v1, %v1873_v20 }
 0x2e6   : > { %1918 = vst.msk [vmem:[%s3311_s12 + $0x38] sm:$0xff] %vm1910_vm15, %v1901_v28 }
 0x2eb   : > { %v1875_v31 = vpop.xlane.xlu2 %1874 }
 0x2ec   : > { %v1902_v29 = vadd.f32 %v2596_v1, %v1875_v31 }
 0x2ee   : > { %1919 = vst.msk [vmem:[%s3311_s12 + $0x40] sm:$0xff] %vm1910_vm15, %v1902_v29 }
 0x2f3   : > { %v1877_v39 = vpop.xlane.xlu0 %1876 }
 0x2f4   : > { %v1903_v5 = vadd.f32 %v2596_v1, %v1877_v39 }
 0x2f6   : > { %1920 = vst.msk [vmem:[%s3311_s12 + $0x48] sm:$0xff] %vm1910_vm15, %v1903_v5 }
 0x2fb   : > { %v1879_v19 = vpop.xlane.xlu1 %1878 }
 0x2fc   : > { %v1904_v55 = vadd.f32 %v2596_v1, %v1879_v19 }
 0x2fe   : > { %1921 = vst.msk [vmem:[%s3311_s12 + $0x50] sm:$0xff] %vm1910_vm15, %v1904_v55 }
 0x303   : > { %v1881_v35 = vpop.xlane.xlu2 %1880 }
 0x304   : > { %v1905_v40 = vadd.f32 %v2596_v1, %v1881_v35 }
 0x306   : > { %1922 = vst.msk [vmem:[%s3311_s12 + $0x58] sm:$0xff] %vm1910_vm15, %v1905_v40 }
 0x30b   : > { %v1883_v53 = vpop.xlane.xlu0 %1882 }
 0x30c   : > { %v1906_v41 = vadd.f32 %v2596_v1, %v1883_v53 }
 0x30e   : > { %1923 = vst.msk [vmem:[%s3311_s12 + $0x60] sm:$0xff] %vm1910_vm15, %v1906_v41 }
 0x313   : > { %v1885_v59 = vpop.xlane.xlu1 %1884 }
 0x314   : > { %v1907_v58 = vadd.f32 %v2596_v1, %v1885_v59 }
 0x316   : > { %1924 = vst.msk [vmem:[%s3311_s12 + $0x68] sm:$0xff] %vm1910_vm15, %v1907_v58 }
 0x31b   : > { %v1887_v33 = vpop.xlane.xlu2 %1886 }
 0x31c   : > { %v1908_v42 = vadd.f32 %v2596_v1, %v1887_v33 }
 0x31e   : > { %1925 = vst.msk [vmem:[%s3311_s12 + $0x70] sm:$0xff] %vm1910_vm15, %v1908_v42 }
 0x323   : > { %v1889_v43 = vpop.xlane.xlu0 %1888 }
 0x324   : > { %v1909_v46 = vadd.f32 %v2596_v1, %v1889_v43 }
 0x326   : > { %1926 = vst.msk [vmem:[%s3311_s12 + $0x78] sm:$0xff] %vm1910_vm15, %v1909_v46 }
 0x327 PF: > { %p24_p4 = scmp.ge.s32.totalorder %s2927_s21, 4   ;;  %s3383_s15 = smov %s2781_s16 }
 0x328   : > { %s3384_s16 = smov %s2785_s17  ;;  %s3385_s17 = smov %s2936_s11 }
 0x329   : > { %s3386_s18 = smov %s2927_s21  ;;  %26 = sbr.rel (!%p24_p4) target bundleno = 8 (0x8), region = 116 }
 0x32e   :  { %1949 = vsyncpa [#allocation4], 1 }
 0x32f   :  { %1951 = vsyncpa [#allocation4 + $0x1], 1 }
 0x330   :  { %1952 = vsyncpa [#allocation6], 1 }
 0x331   :  { %1953 = vsyncpa [#allocation9], 1 }

</bundles_post_ra>
